<compile_context>
chip_gen: v7x
topology: tpu7x:2x2x1
jax: 0.10.0
libtpu: 0.0.40
codegen_flags: <defaults>
</compile_context>

<pallas_src>
import jax
import jax.numpy as jnp
from jax.experimental import pallas as pl
from jax.experimental.pallas import tpu as pltpu

# --- deterministic "config" values (stand-ins for model_cfg) -----------------
VOXEL_SIZE = 0.02
SEMANTIC_THR = 0.15
SEMANTIC_ITER_VALUE = 0.02
SEMANTIC_MIN_THR = 0.05
NUM_FEAT_COLS = 3  # e.g. per-point RGB features

_LANE = 128
_SUBLANE = 8
# Conservative double-buffered scoped-VMEM budget: v7x has only 64 MiB of
# physical VMEM per TensorCore, so stay well under it (review: <= ~32-40 MiB).
_VMEM_BUDGET = 40 * 1024 * 1024


def _round_up(x, m):
    return ((x + m - 1) // m) * m


def _padded_vmem_bytes(rows, cols, itemsize=4):
    """VMEM bytes of one (rows, cols) 32-bit buffer after (8, 128) tiling."""
    return _round_up(max(rows, 1), _SUBLANE) * _round_up(max(cols, 1), _LANE) * itemsize


def _has_two_tensorcores():
    """Best-effort detection of 2-TensorCore (v7x-class) chips; safe fallback."""
    try:
        kind = jax.devices()[0].device_kind.lower()
    except Exception:
        return False
    return ("v7" in kind) or ("7x" in kind)


def voxelize(points, voxel_size=VOXEL_SIZE, tile_n=32768):
    """CAGroup3D.voxelization() in one Pallas pass over the native [N, D] points.

    Returns:
      coordinates  f32 [N, 4]   -- points[:, :4] with columns 1..3 divided by
                                   voxel_size (same float divide as torch `/=`)
      features     f32 [N, D-4] -- points[:, 4:] passthrough
      voxel_coords i32 [N, 4]   -- [batch, floor(x/vs), floor(y/vs), floor(z/vs)],
                                   i.e. the integer voxel indices MinkowskiEngine
                                   would quantize to.
    # TODO(synk): MinkowskiEngine additionally de-duplicates voxel coordinates
    # (hashing) when building the SparseTensor; that data-dependent step is not
    # reproduced here.
    """
    n, d = points.shape
    assert d >= 5, "CAGroup3D points carry [batch, x, y, z, feat...]"
    dtype = points.dtype
    n_feat = d - 4
    vs = float(voxel_size)

    # --- tile sizing ----------------------------------------------------------
    # Requested tile, clipped to what the point count needs (sublane aligned).
    blk = max(_SUBLANE, min(int(tile_n), _round_up(n, _SUBLANE)))

    # v7x only: keep >= 2 grid steps so dimension_semantics=("parallel",) can
    # shard the grid across both TensorCores.  On single-TC v5e/v6e the grid is
    # a serial loop, so splitting would just double the fixed per-step overhead.
    if _has_two_tensorcores() and n > 2 * 1024:
        blk = min(blk, _round_up(pl.cdiv(n, 2), _SUBLANE))

    # Cap the tile from the actual double-buffered, 128-lane-padded VMEM cost of
    # all four streams (input, coords, feats, voxel indices).
    per_point_vmem = 2 * 4 * (_round_up(d, _LANE) + _round_up(4, _LANE)
                              + _round_up(n_feat, _LANE) + _round_up(4, _LANE))
    blk_fit = max(_SUBLANE, (_VMEM_BUDGET // per_point_vmem) // _SUBLANE * _SUBLANE)
    blk = min(blk, blk_fit)

    grid = pl.cdiv(n, blk)  # ragged last block is masked by the Pallas pipeline

    dbuf_footprint = 2 * (_padded_vmem_bytes(blk, d) + _padded_vmem_bytes(blk, 4)
                          + _padded_vmem_bytes(blk, n_feat) + _padded_vmem_bytes(blk, 4))
    vmem_limit = int(dbuf_footprint + (8 << 20))  # computed footprint + headroom

    def kernel(pts_ref, coord_ref, feat_ref, vox_ref):
        pts = pts_ref[...]                   # (blk, d); point fields on lanes
        batch_col = pts[:, 0:1]              # batch index column, NOT scaled
        xyz_scaled = pts[:, 1:4] / vs        # exact same divide as torch `/=`
        # float coordinates (module contract)
        coord_ref[:, 0:1] = batch_col
        coord_ref[:, 1:4] = xyz_scaled
        # feature passthrough
        feat_ref[...] = pts[:, 4:]
        # fused MinkowskiEngine-style quantization to integer voxel indices
        vox_ref[:, 0:1] = batch_col.astype(jnp.int32)
        vox_ref[:, 1:4] = jnp.floor(xyz_scaled).astype(jnp.int32)

    coords, feats, vox = pl.pallas_call(
        kernel,
        out_shape=(
            jax.ShapeDtypeStruct((n, 4), dtype),
            jax.ShapeDtypeStruct((n, n_feat), dtype),
            jax.ShapeDtypeStruct((n, 4), jnp.int32),
        ),
        grid_spec=pltpu.PrefetchScalarGridSpec(
            num_scalar_prefetch=0,
            grid=(grid,),
            in_specs=[pl.BlockSpec((blk, d), lambda i: (i, 0))],
            out_specs=[
                pl.BlockSpec((blk, 4), lambda i: (i, 0)),
                pl.BlockSpec((blk, n_feat), lambda i: (i, 0)),
                pl.BlockSpec((blk, 4), lambda i: (i, 0)),
            ],
        ),
        compiler_params=pltpu.CompilerParams(
            dimension_semantics=("parallel",),
            vmem_limit_bytes=vmem_limit,
        ),
    )(points)
    return coords, feats, vox


def cagroup3d_forward(batch_dict):
    """Pallas/JAX equivalent of CAGroup3D.forward() up to the sparse sub-modules."""
    cur_epoch = batch_dict["cur_epoch"]
    # self.dense_head.semantic_threshold = max(thr - int(epoch)*iter, min_thr)
    semantic_threshold = jnp.maximum(
        jnp.asarray(SEMANTIC_THR, jnp.float32)
        - jnp.trunc(jnp.asarray(cur_epoch, jnp.float32)) * SEMANTIC_ITER_VALUE,
        jnp.asarray(SEMANTIC_MIN_THR, jnp.float32),
    )

    coords, feats, voxel_coords = voxelize(batch_dict["points"])

    # TODO(synk): BiResNet sparse-conv backbone, CAGroup3DHead and
    # CAGroup3DRoIHead consume MinkowskiEngine sparse tensors with
    # data-dependent sparsity and config-defined (unknown) weight shapes;
    # they have no clean dense Pallas equivalent and are not faked here.
    return {
        "sp_coordinates": coords,
        "sp_features": feats,
        "sp_voxel_coords": voxel_coords,
        "semantic_threshold": semantic_threshold,
    }


if __name__ == "__main__":
    key = jax.random.PRNGKey(0)
    n_points = 777  # deliberately NOT a multiple of 8/128: exercises the ragged last block
    d = 4 + NUM_FEAT_COLS

    kb, kx, kf = jax.random.split(key, 3)
    batch_idx = jax.random.randint(kb, (n_points, 1), 0, 2).astype(jnp.float32)
    xyz = jax.random.uniform(kx, (n_points, 3), minval=-3.0, maxval=3.0,
                             dtype=jnp.float32)
    feats = jax.random.uniform(kf, (n_points, NUM_FEAT_COLS), dtype=jnp.float32)
    points = jnp.concatenate([batch_idx, xyz, feats], axis=1)

    batch_dict = {
        "points": points,
        "cur_epoch": jnp.asarray(3.0, jnp.float32),
        "batch_size": 2,
    }

    out = jax.block_until_ready(cagroup3d_forward(batch_dict))

    # reference semantics check (pure JAX)
    ref_coords = points[:, :4].at[:, 1:].set(points[:, 1:4] / VOXEL_SIZE)
    ref_thr = max(SEMANTIC_THR - 3 * SEMANTIC_ITER_VALUE, SEMANTIC_MIN_THR)

    assert out["sp_coordinates"].shape == (n_points, 4)
    assert out["sp_features"].shape == (n_points, NUM_FEAT_COLS)
    assert out["sp_voxel_coords"].shape == (n_points, 4)
    assert out["sp_voxel_coords"].dtype == jnp.int32
    assert jnp.allclose(out["sp_coordinates"], ref_coords, rtol=1e-5, atol=1e-5)
    assert jnp.allclose(out["sp_features"], points[:, 4:])
    # voxel indices must be exactly the floor of the coordinates the kernel returned
    assert jnp.array_equal(out["sp_voxel_coords"],
                           jnp.floor(out["sp_coordinates"]).astype(jnp.int32))
    assert jnp.allclose(out["semantic_threshold"], jnp.float32(ref_thr))

    print("KERNEL_OK")
</pallas_src>

<mosaic_0001>
module attributes {stable_mosaic.version = 11 : i64} {
  func.func @kernel(%arg0: i32, %arg1: memref<784x7xf32, #tpu.memory_space<vmem>>, %arg2: memref<784x4xf32, #tpu.memory_space<vmem>>, %arg3: memref<784x3xf32, #tpu.memory_space<vmem>>, %arg4: memref<784x4xi32, #tpu.memory_space<vmem>>) attributes {dimension_semantics = [#tpu.dimension_semantics<parallel>], iteration_bounds = array<i64: 1>, scalar_prefetch = 0 : i64, scratch_operands = 0 : i64, tpu.core_type = #tpu.core_type<tc>, window_params = [{transform_indices = @transform_0, window_bounds = array<i64: 784, 7>}, {transform_indices = @transform_1, window_bounds = array<i64: 784, 4>}, {transform_indices = @transform_2, window_bounds = array<i64: 784, 3>}, {transform_indices = @transform_3, window_bounds = array<i64: 784, 4>}]} {
    %c0 = arith.constant 0 : index
    %c0_0 = arith.constant 0 : index
    %0 = vector.load %arg1[%c0, %c0_0] : memref<784x7xf32, #tpu.memory_space<vmem>>, vector<784x7xf32>
    %1 = vector.extract_strided_slice %0 {offsets = [0, 0], sizes = [784, 1], strides = [1, 1]} : vector<784x7xf32> to vector<784x1xf32>
    %2 = vector.extract_strided_slice %0 {offsets = [0, 1], sizes = [784, 3], strides = [1, 1]} : vector<784x7xf32> to vector<784x3xf32>
    %cst = arith.constant 2.000000e-02 : f32
    %3 = vector.broadcast %cst : f32 to vector<784x3xf32>
    %4 = arith.divf %2, %3 : vector<784x3xf32>
    %c0_1 = arith.constant 0 : index
    %c0_2 = arith.constant 0 : index
    %5 = vector.load %arg2[%c0_1, %c0_2] : memref<784x4xf32, #tpu.memory_space<vmem>>, vector<784x1xf32>
    tpu.vector_store %arg2[%c0_1, %c0_2], %1 {strides = array<i32>} : memref<784x4xf32, #tpu.memory_space<vmem>>, vector<784x1xf32>,
    %c0_3 = arith.constant 0 : index
    %c1 = arith.constant 1 : index
    %6 = vector.load %arg2[%c0_3, %c1] : memref<784x4xf32, #tpu.memory_space<vmem>>, vector<784x3xf32>
    tpu.vector_store %arg2[%c0_3, %c1], %4 {strides = array<i32>} : memref<784x4xf32, #tpu.memory_space<vmem>>, vector<784x3xf32>,
    %7 = vector.extract_strided_slice %0 {offsets = [0, 4], sizes = [784, 3], strides = [1, 1]} : vector<784x7xf32> to vector<784x3xf32>
    %c0_4 = arith.constant 0 : index
    %c0_5 = arith.constant 0 : index
    %8 = vector.load %arg3[%c0_4, %c0_5] : memref<784x3xf32, #tpu.memory_space<vmem>>, vector<784x3xf32>
    tpu.vector_store %arg3[%c0_4, %c0_5], %7 {strides = array<i32>} : memref<784x3xf32, #tpu.memory_space<vmem>>, vector<784x3xf32>,
    %9 = arith.fptosi %1 : vector<784x1xf32> to vector<784x1xi32>
    %c0_6 = arith.constant 0 : index
    %c0_7 = arith.constant 0 : index
    %10 = vector.load %arg4[%c0_6, %c0_7] : memref<784x4xi32, #tpu.memory_space<vmem>>, vector<784x1xi32>
    tpu.vector_store %arg4[%c0_6, %c0_7], %9 {strides = array<i32>} : memref<784x4xi32, #tpu.memory_space<vmem>>, vector<784x1xi32>,
    %11 = math.floor %4 : vector<784x3xf32>
    %12 = arith.fptosi %11 : vector<784x3xf32> to vector<784x3xi32>
    %c0_8 = arith.constant 0 : index
    %c1_9 = arith.constant 1 : index
    %13 = vector.load %arg4[%c0_8, %c1_9] : memref<784x4xi32, #tpu.memory_space<vmem>>, vector<784x3xi32>
    tpu.vector_store %arg4[%c0_8, %c1_9], %12 {strides = array<i32>} : memref<784x4xi32, #tpu.memory_space<vmem>>, vector<784x3xi32>,
    return
  }
  func.func @transform_0(%arg0: i32) -> (i32, i32) {
    %c0_i32 = arith.constant 0 : i32
    %c0_i32_0 = arith.constant 0 : i32
    return %arg0, %c0_i32 : i32, i32
  }
  func.func @transform_1(%arg0: i32) -> (i32, i32) {
    %c0_i32 = arith.constant 0 : i32
    %c0_i32_0 = arith.constant 0 : i32
    return %arg0, %c0_i32 : i32, i32
  }
  func.func @transform_2(%arg0: i32) -> (i32, i32) {
    %c0_i32 = arith.constant 0 : i32
    %c0_i32_0 = arith.constant 0 : i32
    return %arg0, %c0_i32 : i32, i32
  }
  func.func @transform_3(%arg0: i32) -> (i32, i32) {
    %c0_i32 = arith.constant 0 : i32
    %c0_i32_0 = arith.constant 0 : i32
    return %arg0, %c0_i32 : i32, i32
  }
}

</mosaic_0001>

<bundles_post_ra>
// kernel: tpu_custom_call.1
= control target key start
LH: loop header
LB: loop body
LE: loop exit
PB: predicated region body
PF: predicated region fallthrough
CT: control target
= control target key end

     0   :  { %vm208_vm0 = vcmask 7168   ;;  %vm307_vm1 = vcmask 31752   ;;  %s1792_s18 = smov 124   ;;  %vm798_vm2 = vcmask 23552   ;;  %s4729_s0 = inlined_call_operand.vmem [shape: f32[777,7], index: 0, kind: input, shape index: {}]   ;;  %s4730_s1 = inlined_call_operand.vmem [shape: f32[777,4], index: 1, kind: output, shape index: {0}]   ;;  %s4731_s3 = inlined_call_operand.vmem [shape: s32[777,4], index: 3, kind: output, shape index: {2}]   ;;  %s4732_s2 = inlined_call_operand.vmem [shape: f32[777,3], index: 2, kind: output, shape index: {1}]  }
   0x1   :  { %v13_v0 = vld [vmem:[%s4729_s0 + $0x10] sm:$0xff]  ;;  %v11_v1 = vld [vmem:[%s4729_s0] sm:$0xff]  ;;  %v14_v2 = vld [vmem:[%s4729_s0 + $0x18] sm:$0xff] }
   0x2   :  { %508 = vrot.lane.b32.xlu1 %v13_v0, %s1792_s18  ;;  %v112_v3 = vmul.f32 50.0, %v13_v0  ;;  %211 = vst.msk [vmem:[%s4730_s1 + $0x10] sm:$0xff] %vm208_vm0, %v13_v0  ;;  %v1403_v4 = vtrunc.f32 %v13_v0  ;;  %504 = vrot.lane.b32.xlu0 %v11_v1, %s1792_s18  ;;  %v110_v5 = vmul.f32 50.0, %v11_v1  ;;  %209 = vst.msk [vmem:[%s4730_s1] sm:$0xff] %vm208_vm0, %v11_v1  ;;  %v1399_v6 = vtrunc.f32 %v11_v1 }
   0x3   :  { %212 = vst.msk [vmem:[%s4730_s1 + $0x18] sm:$0xff] %vm208_vm0, %v14_v2  ;;  %v12_v7 = vld [vmem:[%s4729_s0 + $0x8] sm:$0xff]  ;;  %v113_v9 = vmul.f32 50.0, %v14_v2  ;;  %v1405_v10 = vtrunc.f32 %v14_v2  ;;  %v1856_v13 = vld [vmem:[%s4729_s0 + $0x20] sm:$0xff]  ;;  %v1861_v14 = vld [vmem:[%s4729_s0 + $0x38] sm:$0xff] }
   0x4   :  { %v1842_v8 = vld [vmem:[%s4729_s0 + $0x28] sm:$0xff]  ;;  %v111_v11 = vmul.f32 50.0, %v12_v7  ;;  %210 = vst.msk [vmem:[%s4730_s1 + $0x8] sm:$0xff] %vm208_vm0, %v12_v7  ;;  %v1401_v12 = vtrunc.f32 %v12_v7  ;;  %v1866_v15 = vld [vmem:[%s4729_s0 + $0x30] sm:$0xff]  ;;  %v1404_v16 = vcvt.f32.s32 %v1403_v4  ;;  %v1095_v17 = vfloor.f32 %v112_v3  ;;  %213 = vst.msk [vmem:[%s4730_s1 + $0x20] sm:$0xff] %vm208_vm0, %v1856_v13 }
   0x5   :  { %214 = vst.msk [vmem:[%s4730_s1 + $0x28] sm:$0xff] %vm208_vm0, %v1842_v8  ;;  %v1400_v18 = vcvt.f32.s32 %v1399_v6  ;;  %v1093_v19 = vfloor.f32 %v110_v5  ;;  %216 = vst.msk [vmem:[%s4730_s1 + $0x38] sm:$0xff] %vm208_vm0, %v1861_v14  ;;  %v1894_v20 = vld [vmem:[%s4729_s0 + $0x48] sm:$0xff]  ;;  %v1899_v21 = vld [vmem:[%s4729_s0 + $0x40] sm:$0xff]  ;;  %v1406_v23 = vcvt.f32.s32 %v1405_v10  ;;  %v1096_v24 = vfloor.f32 %v113_v9 }
   0x6   :  { %310 = vst.msk [vmem:[%s4730_s1 + $0x10] sm:$0xff] %vm307_vm1, %v112_v3  ;;  %308 = vst.msk [vmem:[%s4730_s1] sm:$0xff] %vm307_vm1, %v110_v5  ;;  %v1904_v22 = vld [vmem:[%s4729_s0 + $0x58] sm:$0xff]  ;;  %v1402_v25 = vcvt.f32.s32 %v1401_v12  ;;  %v1094_v26 = vfloor.f32 %v111_v11  ;;  %v1932_v27 = vld [vmem:[%s4729_s0 + $0x50] sm:$0xff]  ;;  %v1599_v30 = vtrunc.f32 %v1095_v17  ;;  %v115_v32 = vmul.f32 50.0, %v1842_v8 }
   0x7   :  { %215 = vst.msk [vmem:[%s4730_s1 + $0x30] sm:$0xff] %vm208_vm0, %v1866_v15  ;;  %218 = vst.msk [vmem:[%s4730_s1 + $0x48] sm:$0xff] %vm208_vm0, %v1894_v20  ;;  %v1937_v28 = vld [vmem:[%s4729_s0 + $0x68] sm:$0xff]  ;;  %v1942_v29 = vld [vmem:[%s4729_s0 + $0x60] sm:$0xff]  ;;  %v1595_v31 = vtrunc.f32 %v1093_v19  ;;  %v1409_v33 = vtrunc.f32 %v1842_v8  ;;  %v1601_v36 = vtrunc.f32 %v1096_v24  ;;  %v114_v38 = vmul.f32 50.0, %v1856_v13 }
   0x8   :  { %311 = vst.msk [vmem:[%s4730_s1 + $0x18] sm:$0xff] %vm307_vm1, %v113_v9  ;;  %309 = vst.msk [vmem:[%s4730_s1 + $0x8] sm:$0xff] %vm307_vm1, %v111_v11  ;;  %510 = vrot.lane.b32.xlu1 %v14_v2, %s1792_s18  ;;  %506 = vrot.lane.b32.xlu0 %v12_v7, %s1792_s18  ;;  %v1597_v37 = vtrunc.f32 %v1094_v26  ;;  %v1407_v39 = vtrunc.f32 %v1856_v13  ;;  %v1600_v43 = vcvt.f32.s32 %v1599_v30  ;;  %v1098_v46 = vfloor.f32 %v115_v32 }
   0x9   :  { %217 = vst.msk [vmem:[%s4730_s1 + $0x40] sm:$0xff] %vm208_vm0, %v1899_v21  ;;  %220 = vst.msk [vmem:[%s4730_s1 + $0x58] sm:$0xff] %vm208_vm0, %v1904_v22  ;;  %v1974_v34 = vld [vmem:[%s4729_s0 + $0x78] sm:$0xff]  ;;  %v1979_v35 = vld [vmem:[%s4729_s0 + $0x70] sm:$0xff]  ;;  %v1596_v44 = vcvt.f32.s32 %v1595_v31  ;;  %v1410_v45 = vcvt.f32.s32 %v1409_v33  ;;  %v1602_v50 = vcvt.f32.s32 %v1601_v36  ;;  %v1097_v53 = vfloor.f32 %v114_v38 }
   0xa   :  { %997 = vst.msk [vmem:[%s4731_s3 + $0x10] sm:$0xff] %vm208_vm0, %v1404_v16  ;;  %995 = vst.msk [vmem:[%s4731_s3] sm:$0xff] %vm208_vm0, %v1400_v18  ;;  %v2004_v40 = vld [vmem:[%s4729_s0 + $0x88] sm:$0xff]  ;;  %v2009_v41 = vld [vmem:[%s4729_s0 + $0x80] sm:$0xff]  ;;  %v1598_v51 = vcvt.f32.s32 %v1597_v37  ;;  %v1408_v52 = vcvt.f32.s32 %v1407_v39  ;;  %v1605_v57 = vtrunc.f32 %v1098_v46  ;;  %v117_v58 = vmul.f32 50.0, %v1861_v14 }
   0xb   :  { %219 = vst.msk [vmem:[%s4730_s1 + $0x50] sm:$0xff] %vm208_vm0, %v1932_v27  ;;  %222 = vst.msk [vmem:[%s4730_s1 + $0x68] sm:$0xff] %vm208_vm0, %v1937_v28  ;;  %v2014_v42 = vld [vmem:[%s4729_s0 + $0x98] sm:$0xff]  ;;  %v2038_v47 = vld [vmem:[%s4729_s0 + $0x90] sm:$0xff]  ;;  %v1413_v59 = vtrunc.f32 %v1861_v14  ;;  %v116_v60 = vmul.f32 50.0, %v1866_v15  ;;  %v1603_v63 = vtrunc.f32 %v1097_v53  ;;  %v1411_v0 = vtrunc.f32 %v1866_v15 }
   0xc   :  { %221 = vst.msk [vmem:[%s4730_s1 + $0x60] sm:$0xff] %vm208_vm0, %v1942_v29  ;;  %998 = vst.msk [vmem:[%s4731_s3 + $0x18] sm:$0xff] %vm208_vm0, %v1406_v23  ;;  %v2043_v48 = vld [vmem:[%s4729_s0 + $0xa8] sm:$0xff]  ;;  %v2048_v49 = vld [vmem:[%s4729_s0 + $0xa0] sm:$0xff]  ;;  %v119_v1 = vmul.f32 50.0, %v1894_v20  ;;  %v1417_v2 = vtrunc.f32 %v1894_v20  ;;  %v1606_v6 = vcvt.f32.s32 %v1605_v57  ;;  %v118_v30 = vmul.f32 50.0, %v1899_v21 }
   0xd   :  { %996 = vst.msk [vmem:[%s4731_s3 + $0x8] sm:$0xff] %vm208_vm0, %v1402_v25  ;;  %224 = vst.msk [vmem:[%s4730_s1 + $0x78] sm:$0xff] %vm208_vm0, %v1974_v34  ;;  %v2072_v54 = vld [vmem:[%s4729_s0 + $0xb8] sm:$0xff]  ;;  %v2077_v55 = vld [vmem:[%s4729_s0 + $0xb0] sm:$0xff]  ;;  %v1414_v7 = vcvt.f32.s32 %v1413_v59  ;;  %v1099_v9 = vfloor.f32 %v116_v60  ;;  %v1412_v16 = vcvt.f32.s32 %v1411_v0  ;;  %v1415_v31 = vtrunc.f32 %v1899_v21 }
   0xe   :  { %223 = vst.msk [vmem:[%s4730_s1 + $0x70] sm:$0xff] %vm208_vm0, %v1979_v35  ;;  %226 = vst.msk [vmem:[%s4730_s1 + $0x88] sm:$0xff] %vm208_vm0, %v2004_v40  ;;  %v2082_v56 = vld [vmem:[%s4729_s0 + $0xc8] sm:$0xff]  ;;  %514 = vrot.lane.b32.xlu1 %v1842_v8, %s1792_s18  ;;  %v1100_v8 = vfloor.f32 %v117_v58  ;;  %v1418_v17 = vcvt.f32.s32 %v1417_v2  ;;  %v1102_v18 = vfloor.f32 %v119_v1  ;;  %v121_v33 = vmul.f32 50.0, %v1904_v22 }
   0xf   :  { %313 = vst.msk [vmem:[%s4730_s1 + $0x28] sm:$0xff] %vm307_vm1, %v115_v32  ;;  %312 = vst.msk [vmem:[%s4730_s1 + $0x20] sm:$0xff] %vm307_vm1, %v114_v38  ;;  %512 = vrot.lane.b32.xlu0 %v1856_v13, %s1792_s18  ;;  %v2121_v61 = vld [vmem:[%s4729_s0 + $0xc0] sm:$0xff]  ;;  %v1604_v13 = vcvt.f32.s32 %v1603_v63  ;;  %v1607_v26 = vtrunc.f32 %v1099_v9  ;;  %v1421_v36 = vtrunc.f32 %v1904_v22  ;;  %v120_v37 = vmul.f32 50.0, %v1932_v27 }
  0x10   :  { %225 = vst.msk [vmem:[%s4730_s1 + $0x80] sm:$0xff] %vm208_vm0, %v2009_v41  ;;  %228 = vst.msk [vmem:[%s4730_s1 + $0x98] sm:$0xff] %vm208_vm0, %v2014_v42  ;;  %v2126_v62 = vld [vmem:[%s4729_s0 + $0xd8] sm:$0xff]  ;;  %v2156_v3 = vld [vmem:[%s4729_s0 + $0xd0] sm:$0xff]  ;;  %v1609_v25 = vtrunc.f32 %v1100_v8  ;;  %v1613_v32 = vtrunc.f32 %v1102_v18  ;;  %v1416_v46 = vcvt.f32.s32 %v1415_v31  ;;  %v1104_v59 = vfloor.f32 %v121_v33 }
  0x11   :  { %227 = vst.msk [vmem:[%s4730_s1 + $0x90] sm:$0xff] %vm208_vm0, %v2038_v47  ;;  %230 = vst.msk [vmem:[%s4730_s1 + $0xa8] sm:$0xff] %vm208_vm0, %v2043_v48  ;;  %v2161_v4 = vld [vmem:[%s4729_s0 + $0xe8] sm:$0xff]  ;;  %v2166_v5 = vld [vmem:[%s4729_s0 + $0xe0] sm:$0xff]  ;;  %v1425_v8 = vtrunc.f32 %v1937_v28 }
  0x12   :  { %229 = vst.msk [vmem:[%s4730_s1 + $0xa0] sm:$0xff] %vm208_vm0, %v2048_v49  ;;  %1000 = vst.msk [vmem:[%s4731_s3 + $0x28] sm:$0xff] %vm208_vm0, %v1410_v45  ;;  %v2194_v10 = vld [vmem:[%s4729_s0 + $0xf8] sm:$0xff]  ;;  %v2199_v11 = vld [vmem:[%s4729_s0 + $0xf0] sm:$0xff]  ;;  %v1608_v45 = vcvt.f32.s32 %v1607_v26  ;;  %v1614_v57 = vcvt.f32.s32 %v1613_v32  ;;  %v1617_v9 = vtrunc.f32 %v1104_v59 }
  0x13   :  { %1291 = vst.msk [vmem:[%s4731_s3 + $0x10] sm:$0xff] %vm307_vm1, %v1600_v43  ;;  %1289 = vst.msk [vmem:[%s4731_s3] sm:$0xff] %vm307_vm1, %v1596_v44  ;;  %v2204_v12 = vld [vmem:[%s4729_s0 + $0x108] sm:$0xff]  ;;  %v2228_v19 = vld [vmem:[%s4729_s0 + $0x100] sm:$0xff]  ;;  %v1610_v44 = vcvt.f32.s32 %v1609_v25  ;;  %v1426_v32 = vcvt.f32.s32 %v1425_v8  ;;  %v124_v8 = vmul.f32 50.0, %v1979_v35 }
  0x14   :  { %232 = vst.msk [vmem:[%s4730_s1 + $0xb8] sm:$0xff] %vm208_vm0, %v2072_v54  ;;  %231 = vst.msk [vmem:[%s4730_s1 + $0xb0] sm:$0xff] %vm208_vm0, %v2077_v55  ;;  %v2233_v23 = vld [vmem:[%s4729_s0 + $0x118] sm:$0xff]  ;;  %v2238_v24 = vld [vmem:[%s4729_s0 + $0x110] sm:$0xff] }
  0x15   :  { %234 = vst.msk [vmem:[%s4730_s1 + $0xc8] sm:$0xff] %vm208_vm0, %v2082_v56  ;;  %999 = vst.msk [vmem:[%s4731_s3 + $0x20] sm:$0xff] %vm208_vm0, %v1408_v52  ;;  %518 = vrot.lane.b32.xlu1 %v1861_v14, %s1792_s18  ;;  %516 = vrot.lane.b32.xlu0 %v1866_v15, %s1792_s18 }
  0x16   :  { %1292 = vst.msk [vmem:[%s4731_s3 + $0x18] sm:$0xff] %vm307_vm1, %v1602_v50  ;;  %1290 = vst.msk [vmem:[%s4731_s3 + $0x8] sm:$0xff] %vm307_vm1, %v1598_v51  ;;  %v2272_v14 = vld [vmem:[%s4729_s0 + $0x128] sm:$0xff]  ;;  %v2277_v15 = vld [vmem:[%s4729_s0 + $0x120] sm:$0xff]  ;;  %v1101_v50 = vfloor.f32 %v118_v30 }
  0x17   :  { %233 = vst.msk [vmem:[%s4730_s1 + $0xc0] sm:$0xff] %vm208_vm0, %v2121_v61  ;;  %236 = vst.msk [vmem:[%s4730_s1 + $0xd8] sm:$0xff] %vm208_vm0, %v2126_v62  ;;  %v2307_v38 = vld [vmem:[%s4729_s0 + $0x138] sm:$0xff]  ;;  %v2312_v39 = vld [vmem:[%s4729_s0 + $0x130] sm:$0xff] }
  0x18   :  { %315 = vst.msk [vmem:[%s4730_s1 + $0x38] sm:$0xff] %vm307_vm1, %v117_v58  ;;  %314 = vst.msk [vmem:[%s4730_s1 + $0x30] sm:$0xff] %vm307_vm1, %v116_v60  ;;  %v2317_v43 = vld [vmem:[%s4729_s0 + $0x148] sm:$0xff]  ;;  %v2341_v51 = vld [vmem:[%s4729_s0 + $0x140] sm:$0xff]  ;;  %v1422_v58 = vcvt.f32.s32 %v1421_v36  ;;  %v1419_v60 = vtrunc.f32 %v1932_v27  ;;  %v1611_v2 = vtrunc.f32 %v1101_v50 }
  0x19   :  { %235 = vst.msk [vmem:[%s4730_s1 + $0xd0] sm:$0xff] %vm208_vm0, %v2156_v3  ;;  %238 = vst.msk [vmem:[%s4730_s1 + $0xe8] sm:$0xff] %vm208_vm0, %v2161_v4  ;;  %v2346_v52 = vld [vmem:[%s4729_s0 + $0x158] sm:$0xff]  ;;  %v2351_v53 = vld [vmem:[%s4729_s0 + $0x150] sm:$0xff] }
  0x1a   :  { %237 = vst.msk [vmem:[%s4730_s1 + $0xe0] sm:$0xff] %vm208_vm0, %v2166_v5  ;;  %240 = vst.msk [vmem:[%s4730_s1 + $0xf8] sm:$0xff] %vm208_vm0, %v2194_v10  ;;  %v2380_v63 = vld [vmem:[%s4729_s0 + $0x168] sm:$0xff]  ;;  %v2385_v0 = vld [vmem:[%s4729_s0 + $0x160] sm:$0xff] }
  0x1b   :  { %317 = vst.msk [vmem:[%s4730_s1 + $0x48] sm:$0xff] %vm307_vm1, %v119_v1  ;;  %1294 = vst.msk [vmem:[%s4731_s3 + $0x28] sm:$0xff] %vm307_vm1, %v1606_v6  ;;  %v2390_v1 = vld [vmem:[%s4729_s0 + $0x178] sm:$0xff]  ;;  %522 = vrot.lane.b32.xlu1 %v1894_v20, %s1792_s18  ;;  %v1103_v6 = vfloor.f32 %v120_v37 }
  0x1c   :  { %239 = vst.msk [vmem:[%s4730_s1 + $0xf0] sm:$0xff] %vm208_vm0, %v2199_v11  ;;  %242 = vst.msk [vmem:[%s4730_s1 + $0x108] sm:$0xff] %vm208_vm0, %v2204_v12  ;;  %520 = vrot.lane.b32.xlu0 %v1899_v21, %s1792_s18  ;;  %v2428_v20 = vld [vmem:[%s4729_s0 + $0x170] sm:$0xff] }
  0x1d   :  { %1002 = vst.msk [vmem:[%s4731_s3 + $0x38] sm:$0xff] %vm208_vm0, %v1414_v7  ;;  %241 = vst.msk [vmem:[%s4730_s1 + $0x100] sm:$0xff] %vm208_vm0, %v2228_v19  ;;  %v123_v7 = vmul.f32 50.0, %v1937_v28  ;;  %v2433_v21 = vld [vmem:[%s4729_s0 + $0x188] sm:$0xff]  ;;  %v2458_v18 = vld [vmem:[%s4729_s0 + $0x180] sm:$0xff]  ;;  %v1615_v31 = vtrunc.f32 %v1103_v6 }
  0x1e   :  { %244 = vst.msk [vmem:[%s4730_s1 + $0x118] sm:$0xff] %vm208_vm0, %v2233_v23  ;;  %243 = vst.msk [vmem:[%s4730_s1 + $0x110] sm:$0xff] %vm208_vm0, %v2238_v24  ;;  %v2463_v25 = vld [vmem:[%s4729_s0 + $0x198] sm:$0xff]  ;;  %v2468_v26 = vld [vmem:[%s4729_s0 + $0x190] sm:$0xff] }
  0x1f   :  { %1293 = vst.msk [vmem:[%s4731_s3 + $0x20] sm:$0xff] %vm307_vm1, %v1604_v13  ;;  %316 = vst.msk [vmem:[%s4730_s1 + $0x40] sm:$0xff] %vm307_vm1, %v118_v30  ;;  %v1420_v13 = vcvt.f32.s32 %v1419_v60  ;;  %v1612_v30 = vcvt.f32.s32 %v1611_v2  ;;  %v2492_v36 = vld [vmem:[%s4729_s0 + $0x1a8] sm:$0xff]  ;;  %v2541_v60 = vld [vmem:[%s4729_s0 + $0x1c0] sm:$0xff]  ;;  %v1616_v2 = vcvt.f32.s32 %v1615_v31 }
  0x20   :  { %1001 = vst.msk [vmem:[%s4731_s3 + $0x30] sm:$0xff] %vm208_vm0, %v1412_v16  ;;  %1004 = vst.msk [vmem:[%s4731_s3 + $0x48] sm:$0xff] %vm208_vm0, %v1418_v17  ;;  %v122_v16 = vmul.f32 50.0, %v1942_v29  ;;  %v1423_v17 = vtrunc.f32 %v1942_v29  ;;  %v2536_v59 = vld [vmem:[%s4729_s0 + $0x1c8] sm:$0xff]  ;;  %526 = vrot.lane.b32.xlu1 %v1904_v22, %s1792_s18 }
  0x21   :  { %246 = vst.msk [vmem:[%s4730_s1 + $0x128] sm:$0xff] %vm208_vm0, %v2272_v14  ;;  %245 = vst.msk [vmem:[%s4730_s1 + $0x120] sm:$0xff] %vm208_vm0, %v2277_v15  ;;  %524 = vrot.lane.b32.xlu0 %v1932_v27, %s1792_s18  ;;  %v2575_v22 = vld [vmem:[%s4729_s0 + $0x1d8] sm:$0xff] }
  0x22   :  { %248 = vst.msk [vmem:[%s4730_s1 + $0x138] sm:$0xff] %vm208_vm0, %v2307_v38  ;;  %247 = vst.msk [vmem:[%s4730_s1 + $0x130] sm:$0xff] %vm208_vm0, %v2312_v39  ;;  %v1105_v50 = vfloor.f32 %v122_v16  ;;  %v2580_v27 = vld [vmem:[%s4729_s0 + $0x1d0] sm:$0xff]  ;;  %v2614_v31 = vld [vmem:[%s4729_s0 + $0x1e0] sm:$0xff] }
  0x23   :  { %250 = vst.msk [vmem:[%s4730_s1 + $0x148] sm:$0xff] %vm208_vm0, %v2317_v43  ;;  %249 = vst.msk [vmem:[%s4730_s1 + $0x140] sm:$0xff] %vm208_vm0, %v2341_v51 }
  0x24   :  { %319 = vst.msk [vmem:[%s4730_s1 + $0x58] sm:$0xff] %vm307_vm1, %v121_v33  ;;  %318 = vst.msk [vmem:[%s4730_s1 + $0x50] sm:$0xff] %vm307_vm1, %v120_v37  ;;  %v1106_v33 = vfloor.f32 %v123_v7  ;;  %v2497_v37 = vld [vmem:[%s4729_s0 + $0x1a0] sm:$0xff]  ;;  %530 = vrot.lane.b32.xlu1 %v1937_v28, %s1792_s18 }
  0x25   :  { %252 = vst.msk [vmem:[%s4730_s1 + $0x158] sm:$0xff] %vm208_vm0, %v2346_v52  ;;  %251 = vst.msk [vmem:[%s4730_s1 + $0x150] sm:$0xff] %vm208_vm0, %v2351_v53  ;;  %528 = vrot.lane.b32.xlu0 %v1942_v29, %s1792_s18  ;;  %v2726_v28 = vld [vmem:[%s4729_s0 + $0x220] sm:$0xff] }
  0x26   :  { %1296 = vst.msk [vmem:[%s4731_s3 + $0x38] sm:$0xff] %vm307_vm1, %v1610_v44  ;;  %1295 = vst.msk [vmem:[%s4731_s3 + $0x30] sm:$0xff] %vm307_vm1, %v1608_v45  ;;  %v2502_v44 = vld [vmem:[%s4729_s0 + $0x1b8] sm:$0xff]  ;;  %v1618_v45 = vcvt.f32.s32 %v1617_v9  ;;  %v1621_v6 = vtrunc.f32 %v1106_v33  ;;  %v1619_v9 = vtrunc.f32 %v1105_v50  ;;  %v1433_v50 = vtrunc.f32 %v2004_v40 }
  0x27   :  { %1003 = vst.msk [vmem:[%s4731_s3 + $0x40] sm:$0xff] %vm208_vm0, %v1416_v46  ;;  %254 = vst.msk [vmem:[%s4730_s1 + $0x168] sm:$0xff] %vm208_vm0, %v2380_v63  ;;  %v1424_v46 = vcvt.f32.s32 %v1423_v17  ;;  %v127_v17 = vmul.f32 50.0, %v2004_v40  ;;  %v2731_v29 = vld [vmem:[%s4729_s0 + $0x238] sm:$0xff] }
  0x28   :  { %253 = vst.msk [vmem:[%s4730_s1 + $0x160] sm:$0xff] %vm208_vm0, %v2385_v0  ;;  %256 = vst.msk [vmem:[%s4730_s1 + $0x178] sm:$0xff] %vm208_vm0, %v2390_v1  ;;  %v1622_v33 = vcvt.f32.s32 %v1621_v6  ;;  %v2658_v6 = vld [vmem:[%s4729_s0 + $0x200] sm:$0xff]  ;;  %534 = vrot.lane.b32.xlu1 %v1974_v34, %s1792_s18 }
  0x29   :  { %1298 = vst.msk [vmem:[%s4731_s3 + $0x48] sm:$0xff] %vm307_vm1, %v1614_v57  ;;  %321 = vst.msk [vmem:[%s4730_s1 + $0x68] sm:$0xff] %vm307_vm1, %v123_v7  ;;  %v125_v57 = vmul.f32 50.0, %v1974_v34  ;;  %v1429_v7 = vtrunc.f32 %v1974_v34  ;;  %532 = vrot.lane.b32.xlu0 %v1979_v35, %s1792_s18 }
  0x2a   :  { %1006 = vst.msk [vmem:[%s4731_s3 + $0x58] sm:$0xff] %vm208_vm0, %v1422_v58  ;;  %255 = vst.msk [vmem:[%s4730_s1 + $0x170] sm:$0xff] %vm208_vm0, %v2428_v20  ;;  %v2531_v58 = vld [vmem:[%s4729_s0 + $0x1b0] sm:$0xff] }
  0x2b   :  { %258 = vst.msk [vmem:[%s4730_s1 + $0x188] sm:$0xff] %vm208_vm0, %v2433_v21  ;;  %257 = vst.msk [vmem:[%s4730_s1 + $0x180] sm:$0xff] %vm208_vm0, %v2458_v18 }
  0x2c   :  { %260 = vst.msk [vmem:[%s4730_s1 + $0x198] sm:$0xff] %vm208_vm0, %v2463_v25  ;;  %259 = vst.msk [vmem:[%s4730_s1 + $0x190] sm:$0xff] %vm208_vm0, %v2468_v26  ;;  %538 = vrot.lane.b32.xlu1 %v2004_v40, %s1792_s18 }
  0x2d   :  { %1005 = vst.msk [vmem:[%s4731_s3 + $0x50] sm:$0xff] %vm208_vm0, %v1420_v13  ;;  %262 = vst.msk [vmem:[%s4730_s1 + $0x1a8] sm:$0xff] %vm208_vm0, %v2492_v36  ;;  %v1108_v13 = vfloor.f32 %v125_v57  ;;  %536 = vrot.lane.b32.xlu0 %v2009_v41, %s1792_s18 }
  0x2e   :  { %320 = vst.msk [vmem:[%s4730_s1 + $0x60] sm:$0xff] %vm307_vm1, %v122_v16  ;;  %1297 = vst.msk [vmem:[%s4731_s3 + $0x40] sm:$0xff] %vm307_vm1, %v1612_v30  ;;  %v1427_v16 = vtrunc.f32 %v1979_v35  ;;  %v2609_v30 = vld [vmem:[%s4729_s0 + $0x1e8] sm:$0xff] }
  0x2f   :  { %261 = vst.msk [vmem:[%s4730_s1 + $0x1a0] sm:$0xff] %vm208_vm0, %v2497_v37  ;;  %264 = vst.msk [vmem:[%s4730_s1 + $0x1b8] sm:$0xff] %vm208_vm0, %v2502_v44 }
  0x30   :  { %1008 = vst.msk [vmem:[%s4731_s3 + $0x68] sm:$0xff] %vm208_vm0, %v1426_v32  ;;  %263 = vst.msk [vmem:[%s4730_s1 + $0x1b0] sm:$0xff] %vm208_vm0, %v2531_v58  ;;  %v2619_v32 = vld [vmem:[%s4729_s0 + $0x1f8] sm:$0xff]  ;;  %542 = vrot.lane.b32.xlu1 %v2014_v42, %s1792_s18 }
  0x31   :  { %266 = vst.msk [vmem:[%s4730_s1 + $0x1c8] sm:$0xff] %vm208_vm0, %v2536_v59  ;;  %265 = vst.msk [vmem:[%s4730_s1 + $0x1c0] sm:$0xff] %vm208_vm0, %v2541_v60  ;;  %540 = vrot.lane.b32.xlu0 %v2038_v47, %s1792_s18 }
  0x32   :  { %1300 = vst.msk [vmem:[%s4731_s3 + $0x58] sm:$0xff] %vm307_vm1, %v1618_v45  ;;  %323 = vst.msk [vmem:[%s4730_s1 + $0x78] sm:$0xff] %vm307_vm1, %v125_v57  ;;  %v1430_v45 = vcvt.f32.s32 %v1429_v7  ;;  %v2648_v57 = vld [vmem:[%s4729_s0 + $0x1f0] sm:$0xff]  ;;  %v1620_v7 = vcvt.f32.s32 %v1619_v9  ;;  %v2682_v9 = vld [vmem:[%s4729_s0 + $0x218] sm:$0xff] }
  0x33   :  { %1007 = vst.msk [vmem:[%s4731_s3 + $0x60] sm:$0xff] %vm208_vm0, %v1424_v46  ;;  %268 = vst.msk [vmem:[%s4730_s1 + $0x1d8] sm:$0xff] %vm208_vm0, %v2575_v22  ;;  %v1107_v46 = vfloor.f32 %v124_v8 }
  0x34   :  { %267 = vst.msk [vmem:[%s4730_s1 + $0x1d0] sm:$0xff] %vm208_vm0, %v2580_v27  ;;  %4765 = vst [vmem:[#allocation2_spill] sm:$0xff] %v2614_v31  ;;  %546 = vrot.lane.b32.xlu1 %v2043_v48, %s1792_s18 }
  0x35   :  { %4766 = vst [vmem:[#allocation3_spill] sm:$0xff] %v2619_v32  ;;  %1299 = vst.msk [vmem:[%s4731_s3 + $0x50] sm:$0xff] %vm307_vm1, %v1616_v2  ;;  %v2653_v2 = vld [vmem:[%s4729_s0 + $0x208] sm:$0xff]  ;;  %544 = vrot.lane.b32.xlu0 %v2048_v49, %s1792_s18 }
  0x36   :  { %322 = vst.msk [vmem:[%s4730_s1 + $0x70] sm:$0xff] %vm307_vm1, %v124_v8  ;;  %4767 = vst [vmem:[#allocation4_spill] sm:$0xff] %v2648_v57  ;;  %v1625_v8 = vtrunc.f32 %v1108_v13  ;;  %v2687_v13 = vld [vmem:[%s4729_s0 + $0x210] sm:$0xff] }
  0x37   :  { %270 = vst.msk [vmem:[%s4730_s1 + $0x1e8] sm:$0xff] %vm208_vm0, %v2609_v30  ;;  %269 = vst.msk [vmem:[%s4730_s1 + $0x1e0] sm:$0xff] %vm208_vm0, %v2614_v31  ;;  %v1428_v31 = vcvt.f32.s32 %v1427_v16  ;;  %v2692_v16 = vld [vmem:[%s4729_s0 + $0x228] sm:$0xff] }
  0x38   :  { %272 = vst.msk [vmem:[%s4730_s1 + $0x1f8] sm:$0xff] %vm208_vm0, %v2619_v32  ;;  %4768 = vst [vmem:[#allocation5_spill] sm:$0xff] %v2653_v2  ;;  %v1110_v32 = vfloor.f32 %v127_v17  ;;  %550 = vrot.lane.b32.xlu1 %v2072_v54, %s1792_s18 }
  0x39   :  { %4769 = vst [vmem:[#allocation6_spill] sm:$0xff] %v2658_v6  ;;  %325 = vst.msk [vmem:[%s4730_s1 + $0x88] sm:$0xff] %vm307_vm1, %v127_v17  ;;  %v1623_v17 = vtrunc.f32 %v1107_v46  ;;  %v129_v46 = vmul.f32 50.0, %v2014_v42  ;;  %548 = vrot.lane.b32.xlu0 %v2077_v55, %s1792_s18 }
  0x3a   :  { %271 = vst.msk [vmem:[%s4730_s1 + $0x1f0] sm:$0xff] %vm208_vm0, %v2648_v57  ;;  %274 = vst.msk [vmem:[%s4730_s1 + $0x208] sm:$0xff] %vm208_vm0, %v2653_v2  ;;  %v126_v2 = vmul.f32 50.0, %v2009_v41  ;;  %v1431_v57 = vtrunc.f32 %v2009_v41 }
  0x3b   :  { %273 = vst.msk [vmem:[%s4730_s1 + $0x200] sm:$0xff] %vm208_vm0, %v2658_v6  ;;  %4770 = vst [vmem:[#allocation7_spill] sm:$0xff] %v2692_v16  ;;  %v1434_v6 = vcvt.f32.s32 %v1433_v50  ;;  %v1437_v50 = vtrunc.f32 %v2014_v42 }
  0x3c   :  { %1302 = vst.msk [vmem:[%s4731_s3 + $0x68] sm:$0xff] %vm307_vm1, %v1622_v33  ;;  %4771 = vst [vmem:[#allocation8_spill] sm:$0xff] %v2726_v28  ;;  %v1626_v33 = vcvt.f32.s32 %v1625_v8  ;;  %v1624_v8 = vcvt.f32.s32 %v1623_v17  ;;  %554 = vrot.lane.b32.xlu1 %v2082_v56, %s1792_s18 }
  0x3d   :  { %1010 = vst.msk [vmem:[%s4731_s3 + $0x78] sm:$0xff] %vm208_vm0, %v1430_v45  ;;  %276 = vst.msk [vmem:[%s4730_s1 + $0x218] sm:$0xff] %vm208_vm0, %v2682_v9  ;;  %v1629_v45 = vtrunc.f32 %v1110_v32  ;;  %v2761_v32 = vld [vmem:[%s4729_s0 + $0x248] sm:$0xff]  ;;  %552 = vrot.lane.b32.xlu0 %v2121_v61, %s1792_s18 }
  0x3e   :  { %275 = vst.msk [vmem:[%s4730_s1 + $0x210] sm:$0xff] %vm208_vm0, %v2687_v13  ;;  %278 = vst.msk [vmem:[%s4730_s1 + $0x228] sm:$0xff] %vm208_vm0, %v2692_v16  ;;  %v128_v16 = vmul.f32 50.0, %v2038_v47 }
  0x3f   :  { %4772 = vst [vmem:[#allocation9_spill] sm:$0xff] %v2731_v29  ;;  %1301 = vst.msk [vmem:[%s4731_s3 + $0x60] sm:$0xff] %vm307_vm1, %v1620_v7  ;;  %v2766_v7 = vld [vmem:[%s4729_s0 + $0x240] sm:$0xff]  ;;  %v1630_v17 = vcvt.f32.s32 %v1629_v45  ;;  %v2839_v45 = vld [vmem:[%s4729_s0 + $0x278] sm:$0xff] }
  0x40   :  { %1009 = vst.msk [vmem:[%s4731_s3 + $0x70] sm:$0xff] %vm208_vm0, %v1428_v31  ;;  %277 = vst.msk [vmem:[%s4730_s1 + $0x220] sm:$0xff] %vm208_vm0, %v2726_v28  ;;  %v2756_v31 = vld [vmem:[%s4729_s0 + $0x230] sm:$0xff]  ;;  %v1109_v28 = vfloor.f32 %v126_v2  ;;  %v1111_v34 = vfloor.f32 %v128_v16  ;;  %558 = vrot.lane.b32.xlu1 %v2126_v62, %s1792_s18 }
  0x41   :  { %280 = vst.msk [vmem:[%s4730_s1 + $0x238] sm:$0xff] %vm208_vm0, %v2731_v29  ;;  %4773 = vst [vmem:[#allocation10_spill] sm:$0xff] %v2756_v31  ;;  %v1432_v29 = vcvt.f32.s32 %v1431_v57  ;;  %v2795_v57 = vld [vmem:[%s4729_s0 + $0x258] sm:$0xff]  ;;  %556 = vrot.lane.b32.xlu0 %v2156_v3, %s1792_s18 }
  0x42   :  { %4774 = vst [vmem:[#allocation11_spill] sm:$0xff] %v2761_v32  ;;  %4775 = vst [vmem:[#allocation12_spill] sm:$0xff] %v2766_v7 }
  0x43   :  { %1012 = vst.msk [vmem:[%s4731_s3 + $0x88] sm:$0xff] %vm208_vm0, %v1434_v6  ;;  %279 = vst.msk [vmem:[%s4730_s1 + $0x230] sm:$0xff] %vm208_vm0, %v2756_v31  ;;  %v2805_v6 = vld [vmem:[%s4729_s0 + $0x268] sm:$0xff]  ;;  %v1435_v31 = vtrunc.f32 %v2038_v47 }
  0x44   :  { %324 = vst.msk [vmem:[%s4730_s1 + $0x80] sm:$0xff] %vm307_vm1, %v126_v2  ;;  %v2800_v2 = vld [vmem:[%s4729_s0 + $0x250] sm:$0xff]  ;;  %4777 = vst [vmem:[#allocation14_spill] sm:$0xff] %v2805_v6  ;;  %562 = vrot.lane.b32.xlu1 %v2161_v4, %s1792_s18 }
  0x45   :  { %282 = vst.msk [vmem:[%s4730_s1 + $0x248] sm:$0xff] %vm208_vm0, %v2761_v32  ;;  %281 = vst.msk [vmem:[%s4730_s1 + $0x240] sm:$0xff] %vm208_vm0, %v2766_v7  ;;  %v1438_v7 = vcvt.f32.s32 %v1437_v50  ;;  %v1112_v32 = vfloor.f32 %v129_v46  ;;  %v1627_v50 = vtrunc.f32 %v1109_v28  ;;  %v130_v28 = vmul.f32 50.0, %v2048_v49  ;;  %560 = vrot.lane.b32.xlu0 %v2166_v5, %s1792_s18 }
  0x46   :  { %4776 = vst [vmem:[#allocation13_spill] sm:$0xff] %v2800_v2  ;;  %1304 = vst.msk [vmem:[%s4731_s3 + $0x78] sm:$0xff] %vm307_vm1, %v1626_v33  ;;  %v2834_v33 = vld [vmem:[%s4729_s0 + $0x260] sm:$0xff] }
  0x47   :  { %327 = vst.msk [vmem:[%s4730_s1 + $0x98] sm:$0xff] %vm307_vm1, %v129_v46  ;;  %4778 = vst [vmem:[#allocation15_spill] sm:$0xff] %v2834_v33  ;;  %v2844_v46 = vld [vmem:[%s4729_s0 + $0x270] sm:$0xff]  ;;  %v1633_v35 = vtrunc.f32 %v1112_v32  ;;  %v1113_v32 = vfloor.f32 %v130_v28 }
  0x48   :  { %284 = vst.msk [vmem:[%s4730_s1 + $0x258] sm:$0xff] %vm208_vm0, %v2795_v57  ;;  %283 = vst.msk [vmem:[%s4730_s1 + $0x250] sm:$0xff] %vm208_vm0, %v2800_v2  ;;  %v1441_v2 = vtrunc.f32 %v2043_v48  ;;  %566 = vrot.lane.b32.xlu1 %v2194_v10, %s1792_s18 }
  0x49   :  { %286 = vst.msk [vmem:[%s4730_s1 + $0x268] sm:$0xff] %vm208_vm0, %v2805_v6  ;;  %4779 = vst [vmem:[#allocation16_spill] sm:$0xff] %v2839_v45  ;;  %v131_v6 = vmul.f32 50.0, %v2043_v48  ;;  %v1635_v40 = vtrunc.f32 %v1113_v32  ;;  %564 = vrot.lane.b32.xlu0 %v2199_v11, %s1792_s18 }
  0x4a   :  { %4780 = vst [vmem:[#allocation17_spill] sm:$0xff] %v2844_v46  ;;  %1303 = vst.msk [vmem:[%s4731_s3 + $0x70] sm:$0xff] %vm307_vm1, %v1624_v8  ;;  %v1628_v8 = vcvt.f32.s32 %v1627_v50 }
  0x4b   :  { %1011 = vst.msk [vmem:[%s4731_s3 + $0x80] sm:$0xff] %vm208_vm0, %v1432_v29  ;;  %285 = vst.msk [vmem:[%s4730_s1 + $0x260] sm:$0xff] %vm208_vm0, %v2834_v33  ;;  %v1439_v29 = vtrunc.f32 %v2048_v49  ;;  %v1634_v33 = vcvt.f32.s32 %v1633_v35  ;;  %v1445_v35 = vtrunc.f32 %v2072_v54  ;;  %v1457_v49 = vtrunc.f32 %v2161_v4 }
  0x4c   :  { %326 = vst.msk [vmem:[%s4730_s1 + $0x90] sm:$0xff] %vm307_vm1, %v128_v16  ;;  %1306 = vst.msk [vmem:[%s4731_s3 + $0x88] sm:$0xff] %vm307_vm1, %v1630_v17  ;;  %v1436_v16 = vcvt.f32.s32 %v1435_v31  ;;  %v1114_v17 = vfloor.f32 %v131_v6  ;;  %570 = vrot.lane.b32.xlu1 %v2204_v12, %s1792_s18 }
  0x4d   :  { %288 = vst.msk [vmem:[%s4730_s1 + $0x278] sm:$0xff] %vm208_vm0, %v2839_v45  ;;  %287 = vst.msk [vmem:[%s4730_s1 + $0x270] sm:$0xff] %vm208_vm0, %v2844_v46  ;;  %v1631_v45 = vtrunc.f32 %v1111_v34  ;;  %v1442_v46 = vcvt.f32.s32 %v1441_v2  ;;  %v1440_v31 = vcvt.f32.s32 %v1439_v29  ;;  %v2905_v2 = vld [vmem:[%s4729_s0 + $0x288] sm:$0xff]  ;;  %568 = vrot.lane.b32.xlu0 %v2228_v19, %s1792_s18 }
  0x4e   :  { %1014 = vst.msk [vmem:[%s4731_s3 + $0x98] sm:$0xff] %vm208_vm0, %v1438_v7  ;;  %1013 = vst.msk [vmem:[%s4731_s3 + $0x90] sm:$0xff] %vm208_vm0, %v1436_v16  ;;  %v133_v7 = vmul.f32 50.0, %v2072_v54  ;;  %v1637_v34 = vtrunc.f32 %v1114_v17  ;;  %v132_v16 = vmul.f32 50.0, %v2077_v55  ;;  %v1636_v17 = vcvt.f32.s32 %v1635_v40 }
  0x4f   :  { %329 = vst.msk [vmem:[%s4730_s1 + $0xa8] sm:$0xff] %vm307_vm1, %v131_v6  ;;  %328 = vst.msk [vmem:[%s4730_s1 + $0xa0] sm:$0xff] %vm307_vm1, %v130_v28  ;;  %v2910_v6 = vld [vmem:[%s4729_s0 + $0x280] sm:$0xff]  ;;  %v1632_v50 = vcvt.f32.s32 %v1631_v45  ;;  %v1443_v45 = vtrunc.f32 %v2077_v55  ;;  %v1446_v28 = vcvt.f32.s32 %v1445_v35  ;;  %v134_v40 = vmul.f32 50.0, %v2121_v61 }
  0x50   :  { %1305 = vst.msk [vmem:[%s4731_s3 + $0x80] sm:$0xff] %vm307_vm1, %v1628_v8  ;;  %1308 = vst.msk [vmem:[%s4731_s3 + $0x98] sm:$0xff] %vm307_vm1, %v1634_v33  ;;  %v1116_v41 = vfloor.f32 %v133_v7  ;;  %v1638_v33 = vcvt.f32.s32 %v1637_v34  ;;  %v1115_v29 = vfloor.f32 %v132_v16  ;;  %v1449_v8 = vtrunc.f32 %v2082_v56  ;;  %v2971_v34 = vld [vmem:[%s4729_s0 + $0x290] sm:$0xff]  ;;  %574 = vrot.lane.b32.xlu1 %v2233_v23, %s1792_s18 }
  0x51   :  { %1016 = vst.msk [vmem:[%s4731_s3 + $0xa8] sm:$0xff] %vm208_vm0, %v1442_v46  ;;  %290 = vst.msk [vmem:[%s4730_s1 + $0x288] sm:$0xff] %vm208_vm0, %v2905_v2  ;;  %v135_v46 = vmul.f32 50.0, %v2082_v56  ;;  %v1444_v32 = vcvt.f32.s32 %v1443_v45  ;;  %v137_v45 = vmul.f32 50.0, %v2126_v62  ;;  %572 = vrot.lane.b32.xlu0 %v2238_v24, %s1792_s18 }
  0x52   :  { %289 = vst.msk [vmem:[%s4730_s1 + $0x280] sm:$0xff] %vm208_vm0, %v2910_v6  ;;  %1015 = vst.msk [vmem:[%s4731_s3 + $0xa0] sm:$0xff] %vm208_vm0, %v1440_v31  ;;  %v1641_v31 = vtrunc.f32 %v1116_v41  ;;  %v1639_v35 = vtrunc.f32 %v1115_v29  ;;  %v1447_v41 = vtrunc.f32 %v2121_v61  ;;  %v1117_v29 = vfloor.f32 %v134_v40 }
  0x53   :  { %331 = vst.msk [vmem:[%s4730_s1 + $0xb8] sm:$0xff] %vm307_vm1, %v133_v7  ;;  %1307 = vst.msk [vmem:[%s4731_s3 + $0x90] sm:$0xff] %vm307_vm1, %v1632_v50  ;;  %v1118_v7 = vfloor.f32 %v135_v46  ;;  %v2966_v50 = vld [vmem:[%s4729_s0 + $0x298] sm:$0xff] }
  0x54   :  { %330 = vst.msk [vmem:[%s4730_s1 + $0xb0] sm:$0xff] %vm307_vm1, %v132_v16  ;;  %333 = vst.msk [vmem:[%s4730_s1 + $0xc8] sm:$0xff] %vm307_vm1, %v135_v46  ;;  %v1450_v16 = vcvt.f32.s32 %v1449_v8  ;;  %v1642_v42 = vcvt.f32.s32 %v1641_v31  ;;  %v1453_v46 = vtrunc.f32 %v2126_v62  ;;  %v136_v8 = vmul.f32 50.0, %v2156_v3  ;;  %578 = vrot.lane.b32.xlu1 %v2272_v14, %s1792_s18 }
  0x55   :  { %1310 = vst.msk [vmem:[%s4731_s3 + $0xa8] sm:$0xff] %vm307_vm1, %v1638_v33  ;;  %1309 = vst.msk [vmem:[%s4731_s3 + $0xa0] sm:$0xff] %vm307_vm1, %v1636_v17  ;;  %v1645_v47 = vtrunc.f32 %v1118_v7  ;;  %v1640_v33 = vcvt.f32.s32 %v1639_v35  ;;  %v1451_v7 = vtrunc.f32 %v2156_v3  ;;  %v3028_v35 = vld [vmem:[%s4729_s0 + $0x2a8] sm:$0xff]  ;;  %v1473_v3 = vtrunc.f32 %v2272_v14  ;;  %576 = vrot.lane.b32.xlu0 %v2277_v15, %s1792_s18 }
  0x56   :  { %1018 = vst.msk [vmem:[%s4731_s3 + $0xb8] sm:$0xff] %vm208_vm0, %v1446_v28  ;;  %292 = vst.msk [vmem:[%s4730_s1 + $0x298] sm:$0xff] %vm208_vm0, %v2966_v50  ;;  %v1448_v28 = vcvt.f32.s32 %v1447_v41  ;;  %v1454_v31 = vcvt.f32.s32 %v1453_v46  ;;  %v1119_v48 = vfloor.f32 %v136_v8  ;;  %v139_v41 = vmul.f32 50.0, %v2161_v4 }
  0x57   :  { %291 = vst.msk [vmem:[%s4730_s1 + $0x290] sm:$0xff] %vm208_vm0, %v2971_v34  ;;  %1017 = vst.msk [vmem:[%s4731_s3 + $0xb0] sm:$0xff] %vm208_vm0, %v1444_v32  ;;  %v1646_v17 = vcvt.f32.s32 %v1645_v47  ;;  %v1120_v32 = vfloor.f32 %v137_v45  ;;  %v1452_v47 = vcvt.f32.s32 %v1451_v7  ;;  %v1455_v46 = vtrunc.f32 %v2166_v5 }
  0x58   :  { %1020 = vst.msk [vmem:[%s4731_s3 + $0xc8] sm:$0xff] %vm208_vm0, %v1450_v16  ;;  %v3033_v16 = vld [vmem:[%s4729_s0 + $0x2a0] sm:$0xff]  ;;  %1019 = vst.msk [vmem:[%s4731_s3 + $0xc0] sm:$0xff] %vm208_vm0, %v1448_v28  ;;  %v1647_v28 = vtrunc.f32 %v1119_v48  ;;  %v141_v7 = vmul.f32 50.0, %v2194_v10  ;;  %v3094_v48 = vld [vmem:[%s4729_s0 + $0x2b0] sm:$0xff] }
  0x59   :  { %332 = vst.msk [vmem:[%s4730_s1 + $0xc0] sm:$0xff] %vm307_vm1, %v134_v40  ;;  %1312 = vst.msk [vmem:[%s4731_s3 + $0xb8] sm:$0xff] %vm307_vm1, %v1642_v42  ;;  %v1643_v40 = vtrunc.f32 %v1117_v29  ;;  %v1649_v42 = vtrunc.f32 %v1120_v32  ;;  %v1458_v29 = vcvt.f32.s32 %v1457_v49  ;;  %582 = vrot.lane.b32.xlu1 %v2307_v38, %s1792_s18  ;;  %580 = vrot.lane.b32.xlu0 %v2312_v39, %s1792_s18 }
  0x5a   :  { %335 = vst.msk [vmem:[%s4730_s1 + $0xd8] sm:$0xff] %vm307_vm1, %v137_v45  ;;  %1311 = vst.msk [vmem:[%s4731_s3 + $0xb0] sm:$0xff] %vm307_vm1, %v1640_v33  ;;  %v138_v45 = vmul.f32 50.0, %v2166_v5  ;;  %v1124_v55 = vfloor.f32 %v141_v7 }
  0x5b   :  { %334 = vst.msk [vmem:[%s4730_s1 + $0xd0] sm:$0xff] %vm307_vm1, %v136_v8  ;;  %1314 = vst.msk [vmem:[%s4731_s3 + $0xc8] sm:$0xff] %vm307_vm1, %v1646_v17  ;;  %v1644_v33 = vcvt.f32.s32 %v1643_v40  ;;  %v1122_v8 = vfloor.f32 %v139_v41  ;;  %v1650_v17 = vcvt.f32.s32 %v1649_v42  ;;  %v3089_v40 = vld [vmem:[%s4729_s0 + $0x2b8] sm:$0xff]  ;;  %v1461_v42 = vtrunc.f32 %v2194_v10 }
  0x5c   :  { %294 = vst.msk [vmem:[%s4730_s1 + $0x2a8] sm:$0xff] %vm208_vm0, %v3028_v35  ;;  %293 = vst.msk [vmem:[%s4730_s1 + $0x2a0] sm:$0xff] %vm208_vm0, %v3033_v16  ;;  %v1121_v32 = vfloor.f32 %v138_v45 }
  0x5d   :  { %1022 = vst.msk [vmem:[%s4731_s3 + $0xd8] sm:$0xff] %vm208_vm0, %v1454_v31  ;;  %1021 = vst.msk [vmem:[%s4731_s3 + $0xd0] sm:$0xff] %vm208_vm0, %v1452_v47  ;;  %v1456_v31 = vcvt.f32.s32 %v1455_v46  ;;  %v1653_v49 = vtrunc.f32 %v1122_v8  ;;  %v140_v47 = vmul.f32 50.0, %v2199_v11  ;;  %v143_v46 = vmul.f32 50.0, %v2204_v12  ;;  %586 = vrot.lane.b32.xlu1 %v2317_v43, %s1792_s18  ;;  %584 = vrot.lane.b32.xlu0 %v2341_v51, %s1792_s18 }
  0x5e   :  { %337 = vst.msk [vmem:[%s4730_s1 + $0xe8] sm:$0xff] %vm307_vm1, %v139_v41  ;;  %336 = vst.msk [vmem:[%s4730_s1 + $0xe0] sm:$0xff] %vm307_vm1, %v138_v45  ;;  %v1648_v41 = vcvt.f32.s32 %v1647_v28  ;;  %v1651_v54 = vtrunc.f32 %v1121_v32  ;;  %v1459_v45 = vtrunc.f32 %v2199_v11  ;;  %v1462_v28 = vcvt.f32.s32 %v1461_v42 }
  0x5f   :  { %1313 = vst.msk [vmem:[%s4731_s3 + $0xc0] sm:$0xff] %vm307_vm1, %v1644_v33  ;;  %1316 = vst.msk [vmem:[%s4731_s3 + $0xd8] sm:$0xff] %vm307_vm1, %v1650_v17  ;;  %v1654_v33 = vcvt.f32.s32 %v1653_v49  ;;  %v1465_v8 = vtrunc.f32 %v2204_v12  ;;  %v3155_v49 = vld [vmem:[%s4729_s0 + $0x2c0] sm:$0xff] }
  0x60   :  { %1024 = vst.msk [vmem:[%s4731_s3 + $0xe8] sm:$0xff] %vm208_vm0, %v1458_v29  ;;  %296 = vst.msk [vmem:[%s4730_s1 + $0x2b8] sm:$0xff] %vm208_vm0, %v3089_v40  ;;  %v1123_v29 = vfloor.f32 %v140_v47  ;;  %v1652_v17 = vcvt.f32.s32 %v1651_v54  ;;  %v1460_v32 = vcvt.f32.s32 %v1459_v45  ;;  %v142_v54 = vmul.f32 50.0, %v2228_v19 }
  0x61   :  { %295 = vst.msk [vmem:[%s4730_s1 + $0x2b0] sm:$0xff] %vm208_vm0, %v3094_v48  ;;  %1023 = vst.msk [vmem:[%s4731_s3 + $0xe0] sm:$0xff] %vm208_vm0, %v1456_v31  ;;  %v1657_v31 = vtrunc.f32 %v1124_v55  ;;  %v1463_v55 = vtrunc.f32 %v2228_v19  ;;  %v145_v45 = vmul.f32 50.0, %v2233_v23  ;;  %v1489_v19 = vtrunc.f32 %v2380_v63  ;;  %590 = vrot.lane.b32.xlu1 %v2346_v52, %s1792_s18  ;;  %588 = vrot.lane.b32.xlu0 %v2351_v53, %s1792_s18 }
  0x62   :  { %339 = vst.msk [vmem:[%s4730_s1 + $0xf8] sm:$0xff] %vm307_vm1, %v141_v7  ;;  %1315 = vst.msk [vmem:[%s4731_s3 + $0xd0] sm:$0xff] %vm307_vm1, %v1648_v41  ;;  %v1126_v7 = vfloor.f32 %v143_v46  ;;  %v3150_v41 = vld [vmem:[%s4729_s0 + $0x2c8] sm:$0xff]  ;;  %v1655_v42 = vtrunc.f32 %v1123_v29  ;;  %v1125_v29 = vfloor.f32 %v142_v54 }
  0x63   :  { %338 = vst.msk [vmem:[%s4730_s1 + $0xf0] sm:$0xff] %vm307_vm1, %v140_v47  ;;  %341 = vst.msk [vmem:[%s4730_s1 + $0x108] sm:$0xff] %vm307_vm1, %v143_v46  ;;  %v1466_v47 = vcvt.f32.s32 %v1465_v8  ;;  %v1658_v56 = vcvt.f32.s32 %v1657_v31  ;;  %v1469_v46 = vtrunc.f32 %v2233_v23  ;;  %v144_v8 = vmul.f32 50.0, %v2238_v24 }
  0x64   :  { %1318 = vst.msk [vmem:[%s4731_s3 + $0xe8] sm:$0xff] %vm307_vm1, %v1654_v33  ;;  %1317 = vst.msk [vmem:[%s4731_s3 + $0xe0] sm:$0xff] %vm307_vm1, %v1652_v17  ;;  %v1661_v61 = vtrunc.f32 %v1126_v7  ;;  %v1656_v33 = vcvt.f32.s32 %v1655_v42  ;;  %v1467_v7 = vtrunc.f32 %v2238_v24  ;;  %v3212_v42 = vld [vmem:[%s4729_s0 + $0x2d8] sm:$0xff] }
  0x65   :  { %1026 = vst.msk [vmem:[%s4731_s3 + $0xf8] sm:$0xff] %vm208_vm0, %v1462_v28  ;;  %298 = vst.msk [vmem:[%s4730_s1 + $0x2c8] sm:$0xff] %vm208_vm0, %v3150_v41  ;;  %v1464_v28 = vcvt.f32.s32 %v1463_v55  ;;  %v1470_v31 = vcvt.f32.s32 %v1469_v46  ;;  %v1127_v62 = vfloor.f32 %v144_v8  ;;  %v147_v55 = vmul.f32 50.0, %v2272_v14  ;;  %594 = vrot.lane.b32.xlu1 %v2380_v63, %s1792_s18  ;;  %592 = vrot.lane.b32.xlu0 %v2385_v0, %s1792_s18 }
  0x66   :  { %297 = vst.msk [vmem:[%s4730_s1 + $0x2c0] sm:$0xff] %vm208_vm0, %v3155_v49  ;;  %1025 = vst.msk [vmem:[%s4731_s3 + $0xf0] sm:$0xff] %vm208_vm0, %v1460_v32  ;;  %v1662_v17 = vcvt.f32.s32 %v1661_v61  ;;  %v1128_v32 = vfloor.f32 %v145_v45  ;;  %v1468_v61 = vcvt.f32.s32 %v1467_v7  ;;  %v1471_v46 = vtrunc.f32 %v2277_v15 }
  0x67   :  { %1028 = vst.msk [vmem:[%s4731_s3 + $0x108] sm:$0xff] %vm208_vm0, %v1466_v47  ;;  %v3217_v47 = vld [vmem:[%s4729_s0 + $0x2d0] sm:$0xff]  ;;  %1027 = vst.msk [vmem:[%s4731_s3 + $0x100] sm:$0xff] %vm208_vm0, %v1464_v28  ;;  %v1663_v28 = vtrunc.f32 %v1127_v62  ;;  %v149_v7 = vmul.f32 50.0, %v2307_v38  ;;  %v3278_v62 = vld [vmem:[%s4729_s0 + $0x2e0] sm:$0xff] }
  0x68   :  { %340 = vst.msk [vmem:[%s4730_s1 + $0x100] sm:$0xff] %vm307_vm1, %v142_v54  ;;  %1320 = vst.msk [vmem:[%s4731_s3 + $0xf8] sm:$0xff] %vm307_vm1, %v1658_v56  ;;  %v1659_v54 = vtrunc.f32 %v1125_v29  ;;  %v1665_v56 = vtrunc.f32 %v1128_v32  ;;  %v1474_v29 = vcvt.f32.s32 %v1473_v3 }
  0x69   :  { %343 = vst.msk [vmem:[%s4730_s1 + $0x118] sm:$0xff] %vm307_vm1, %v145_v45  ;;  %1319 = vst.msk [vmem:[%s4731_s3 + $0xf0] sm:$0xff] %vm307_vm1, %v1656_v33  ;;  %v146_v45 = vmul.f32 50.0, %v2277_v15  ;;  %v1132_v5 = vfloor.f32 %v149_v7  ;;  %598 = vrot.lane.b32.xlu1 %v2390_v1, %s1792_s18  ;;  %596 = vrot.lane.b32.xlu0 %v2428_v20, %s1792_s18 }
  0x6a   :  { %342 = vst.msk [vmem:[%s4730_s1 + $0x110] sm:$0xff] %vm307_vm1, %v144_v8  ;;  %1322 = vst.msk [vmem:[%s4731_s3 + $0x108] sm:$0xff] %vm307_vm1, %v1662_v17  ;;  %v1660_v33 = vcvt.f32.s32 %v1659_v54  ;;  %v1130_v8 = vfloor.f32 %v147_v55  ;;  %v1666_v17 = vcvt.f32.s32 %v1665_v56  ;;  %v3273_v54 = vld [vmem:[%s4729_s0 + $0x2e8] sm:$0xff]  ;;  %v1477_v56 = vtrunc.f32 %v2307_v38 }
  0x6b   :  { %300 = vst.msk [vmem:[%s4730_s1 + $0x2d8] sm:$0xff] %vm208_vm0, %v3212_v42  ;;  %299 = vst.msk [vmem:[%s4730_s1 + $0x2d0] sm:$0xff] %vm208_vm0, %v3217_v47  ;;  %v1129_v32 = vfloor.f32 %v146_v45 }
  0x6c   :  { %1030 = vst.msk [vmem:[%s4731_s3 + $0x118] sm:$0xff] %vm208_vm0, %v1470_v31  ;;  %1029 = vst.msk [vmem:[%s4731_s3 + $0x110] sm:$0xff] %vm208_vm0, %v1468_v61  ;;  %v1472_v31 = vcvt.f32.s32 %v1471_v46  ;;  %v1669_v3 = vtrunc.f32 %v1130_v8  ;;  %v148_v61 = vmul.f32 50.0, %v2312_v39  ;;  %v151_v46 = vmul.f32 50.0, %v2317_v43 }
  0x6d   :  { %345 = vst.msk [vmem:[%s4730_s1 + $0x128] sm:$0xff] %vm307_vm1, %v147_v55  ;;  %344 = vst.msk [vmem:[%s4730_s1 + $0x120] sm:$0xff] %vm307_vm1, %v146_v45  ;;  %v1664_v55 = vcvt.f32.s32 %v1663_v28  ;;  %v1667_v4 = vtrunc.f32 %v1129_v32  ;;  %v1475_v45 = vtrunc.f32 %v2312_v39  ;;  %v1478_v28 = vcvt.f32.s32 %v1477_v56  ;;  %602 = vrot.lane.b32.xlu1 %v2433_v21, %s1792_s18  ;;  %600 = vrot.lane.b32.xlu0 %v2458_v18, %s1792_s18 }
  0x6e   :  { %1321 = vst.msk [vmem:[%s4731_s3 + $0x100] sm:$0xff] %vm307_vm1, %v1660_v33  ;;  %1324 = vst.msk [vmem:[%s4731_s3 + $0x118] sm:$0xff] %vm307_vm1, %v1666_v17  ;;  %v1670_v33 = vcvt.f32.s32 %v1669_v3  ;;  %v1481_v8 = vtrunc.f32 %v2317_v43  ;;  %v3339_v3 = vld [vmem:[%s4729_s0 + $0x2f0] sm:$0xff]  ;;  %v1505_v39 = vtrunc.f32 %v2492_v36 }
  0x6f   :  { %1032 = vst.msk [vmem:[%s4731_s3 + $0x128] sm:$0xff] %vm208_vm0, %v1474_v29  ;;  %302 = vst.msk [vmem:[%s4730_s1 + $0x2e8] sm:$0xff] %vm208_vm0, %v3273_v54  ;;  %v1131_v29 = vfloor.f32 %v148_v61  ;;  %v1668_v17 = vcvt.f32.s32 %v1667_v4  ;;  %v1476_v32 = vcvt.f32.s32 %v1475_v45  ;;  %v150_v4 = vmul.f32 50.0, %v2341_v51 }
  0x70   :  { %301 = vst.msk [vmem:[%s4730_s1 + $0x2e0] sm:$0xff] %vm208_vm0, %v3278_v62  ;;  %1031 = vst.msk [vmem:[%s4731_s3 + $0x120] sm:$0xff] %vm208_vm0, %v1472_v31  ;;  %v1673_v31 = vtrunc.f32 %v1132_v5  ;;  %v1479_v5 = vtrunc.f32 %v2341_v51  ;;  %v153_v45 = vmul.f32 50.0, %v2346_v52 }
  0x71   :  { %347 = vst.msk [vmem:[%s4730_s1 + $0x138] sm:$0xff] %vm307_vm1, %v149_v7  ;;  %1323 = vst.msk [vmem:[%s4731_s3 + $0x110] sm:$0xff] %vm307_vm1, %v1664_v55  ;;  %v1134_v7 = vfloor.f32 %v151_v46  ;;  %v3334_v55 = vld [vmem:[%s4729_s0 + $0x2f8] sm:$0xff]  ;;  %v1671_v56 = vtrunc.f32 %v1131_v29  ;;  %v1133_v29 = vfloor.f32 %v150_v4  ;;  %606 = vrot.lane.b32.xlu1 %v2463_v25, %s1792_s18 }
  0x72   :  { %346 = vst.msk [vmem:[%s4730_s1 + $0x130] sm:$0xff] %vm307_vm1, %v148_v61  ;;  %349 = vst.msk [vmem:[%s4730_s1 + $0x148] sm:$0xff] %vm307_vm1, %v151_v46  ;;  %v1482_v61 = vcvt.f32.s32 %v1481_v8  ;;  %v1674_v10 = vcvt.f32.s32 %v1673_v31  ;;  %v1485_v46 = vtrunc.f32 %v2346_v52  ;;  %v152_v8 = vmul.f32 50.0, %v2351_v53  ;;  %604 = vrot.lane.b32.xlu0 %v2468_v26, %s1792_s18 }
  0x73   :  { %1326 = vst.msk [vmem:[%s4731_s3 + $0x128] sm:$0xff] %vm307_vm1, %v1670_v33  ;;  %1325 = vst.msk [vmem:[%s4731_s3 + $0x120] sm:$0xff] %vm307_vm1, %v1668_v17  ;;  %v1677_v11 = vtrunc.f32 %v1134_v7  ;;  %v1672_v33 = vcvt.f32.s32 %v1671_v56  ;;  %v1483_v7 = vtrunc.f32 %v2351_v53  ;;  %v3396_v56 = vld [vmem:[%s4729_s0 + $0x308] sm:$0xff] }
  0x74   :  { %1034 = vst.msk [vmem:[%s4731_s3 + $0x138] sm:$0xff] %vm208_vm0, %v1478_v28  ;;  %304 = vst.msk [vmem:[%s4730_s1 + $0x2f8] sm:$0xff] %vm208_vm0, %v3334_v55  ;;  %v1480_v28 = vcvt.f32.s32 %v1479_v5  ;;  %v1486_v31 = vcvt.f32.s32 %v1485_v46  ;;  %v1135_v12 = vfloor.f32 %v152_v8  ;;  %v155_v5 = vmul.f32 50.0, %v2380_v63 }
  0x75   :  { %303 = vst.msk [vmem:[%s4730_s1 + $0x2f0] sm:$0xff] %vm208_vm0, %v3339_v3  ;;  %1033 = vst.msk [vmem:[%s4731_s3 + $0x130] sm:$0xff] %vm208_vm0, %v1476_v32  ;;  %v1678_v17 = vcvt.f32.s32 %v1677_v11  ;;  %v1136_v32 = vfloor.f32 %v153_v45  ;;  %v1484_v11 = vcvt.f32.s32 %v1483_v7  ;;  %v1487_v46 = vtrunc.f32 %v2385_v0  ;;  %610 = vrot.lane.b32.xlu1 %v2492_v36, %s1792_s18 }
  0x76   :  { %1036 = vst.msk [vmem:[%s4731_s3 + $0x148] sm:$0xff] %vm208_vm0, %v1482_v61  ;;  %v3401_v61 = vld [vmem:[%s4729_s0 + $0x300] sm:$0xff]  ;;  %1035 = vst.msk [vmem:[%s4731_s3 + $0x140] sm:$0xff] %vm208_vm0, %v1480_v28  ;;  %v1679_v28 = vtrunc.f32 %v1135_v12  ;;  %v157_v7 = vmul.f32 50.0, %v2390_v1  ;;  %608 = vrot.lane.b32.xlu0 %v2497_v37, %s1792_s18 }
  0x77   :  { %348 = vst.msk [vmem:[%s4730_s1 + $0x140] sm:$0xff] %vm307_vm1, %v150_v4  ;;  %1328 = vst.msk [vmem:[%s4731_s3 + $0x138] sm:$0xff] %vm307_vm1, %v1674_v10  ;;  %v1675_v4 = vtrunc.f32 %v1133_v29  ;;  %v1681_v10 = vtrunc.f32 %v1136_v32  ;;  %v1490_v29 = vcvt.f32.s32 %v1489_v19  ;;  %v156_v19 = vmul.f32 50.0, %v2428_v20 }
  0x78   :  { %351 = vst.msk [vmem:[%s4730_s1 + $0x158] sm:$0xff] %vm307_vm1, %v153_v45  ;;  %1327 = vst.msk [vmem:[%s4731_s3 + $0x130] sm:$0xff] %vm307_vm1, %v1672_v33  ;;  %v154_v45 = vmul.f32 50.0, %v2385_v0  ;;  %v1140_v24 = vfloor.f32 %v157_v7  ;;  %v1521_v0 = vtrunc.f32 %v2609_v30 }
  0x79   :  { %350 = vst.msk [vmem:[%s4730_s1 + $0x150] sm:$0xff] %vm307_vm1, %v152_v8  ;;  %1330 = vst.msk [vmem:[%s4731_s3 + $0x148] sm:$0xff] %vm307_vm1, %v1678_v17  ;;  %v1676_v33 = vcvt.f32.s32 %v1675_v4  ;;  %v1138_v8 = vfloor.f32 %v155_v5  ;;  %v1682_v17 = vcvt.f32.s32 %v1681_v10  ;;  %v1680_v4 = vcvt.f32.s32 %v1679_v28  ;;  %614 = vrot.lane.b32.xlu1 %v2502_v44, %s1792_s18 }
  0x7a   :  { %306 = vst.msk [vmem:[%s4730_s1 + $0x308] sm:$0xff] %vm208_vm0, %v3396_v56  ;;  %305 = vst.msk [vmem:[%s4730_s1 + $0x300] sm:$0xff] %vm208_vm0, %v3401_v61  ;;  %v1137_v32 = vfloor.f32 %v154_v45  ;;  %v1491_v10 = vtrunc.f32 %v2428_v20  ;;  %v1497_v28 = vtrunc.f32 %v2433_v21  ;;  %612 = vrot.lane.b32.xlu0 %v2531_v58, %s1792_s18 }
  0x7b   :  { %1038 = vst.msk [vmem:[%s4731_s3 + $0x158] sm:$0xff] %vm208_vm0, %v1486_v31  ;;  %1037 = vst.msk [vmem:[%s4731_s3 + $0x150] sm:$0xff] %vm208_vm0, %v1484_v11  ;;  %v1488_v31 = vcvt.f32.s32 %v1487_v46  ;;  %v1685_v12 = vtrunc.f32 %v1138_v8  ;;  %v159_v11 = vmul.f32 50.0, %v2433_v21  ;;  %v1689_v8 = vtrunc.f32 %v1140_v24 }
  0x7c   :  { %353 = vst.msk [vmem:[%s4730_s1 + $0x168] sm:$0xff] %vm307_vm1, %v155_v5  ;;  %352 = vst.msk [vmem:[%s4730_s1 + $0x160] sm:$0xff] %vm307_vm1, %v154_v45  ;;  %v1493_v5 = vtrunc.f32 %v2390_v1  ;;  %v1683_v23 = vtrunc.f32 %v1137_v32 }
  0x7d   :  { %1329 = vst.msk [vmem:[%s4731_s3 + $0x140] sm:$0xff] %vm307_vm1, %v1676_v33  ;;  %1332 = vst.msk [vmem:[%s4731_s3 + $0x158] sm:$0xff] %vm307_vm1, %v1682_v17  ;;  %v1686_v45 = vcvt.f32.s32 %v1685_v12  ;;  %v1139_v33 = vfloor.f32 %v156_v19  ;;  %v1492_v17 = vcvt.f32.s32 %v1491_v10  ;;  %v1495_v12 = vtrunc.f32 %v2458_v18  ;;  %618 = vrot.lane.b32.xlu1 %v2536_v59, %s1792_s18 }
  0x7e   :  { %1040 = vst.msk [vmem:[%s4731_s3 + $0x168] sm:$0xff] %vm208_vm0, %v1490_v29  ;;  %1039 = vst.msk [vmem:[%s4731_s3 + $0x160] sm:$0xff] %vm208_vm0, %v1488_v31  ;;  %v1494_v46 = vcvt.f32.s32 %v1493_v5  ;;  %v1684_v29 = vcvt.f32.s32 %v1683_v23  ;;  %v1142_v31 = vfloor.f32 %v159_v11  ;;  %v1690_v14 = vcvt.f32.s32 %v1689_v8  ;;  %616 = vrot.lane.b32.xlu0 %v2541_v60, %s1792_s18 }
  0x7f   :  { %355 = vst.msk [vmem:[%s4730_s1 + $0x178] sm:$0xff] %vm307_vm1, %v157_v7  ;;  %1331 = vst.msk [vmem:[%s4731_s3 + $0x150] sm:$0xff] %vm307_vm1, %v1680_v4  ;;  %v1687_v32 = vtrunc.f32 %v1139_v33  ;;  %v1498_v7 = vcvt.f32.s32 %v1497_v28  ;;  %v158_v4 = vmul.f32 50.0, %v2458_v18  ;;  %v161_v5 = vmul.f32 50.0, %v2463_v25 }
  0x80   :  { %354 = vst.msk [vmem:[%s4730_s1 + $0x170] sm:$0xff] %vm307_vm1, %v156_v19  ;;  %357 = vst.msk [vmem:[%s4730_s1 + $0x188] sm:$0xff] %vm307_vm1, %v159_v11  ;;  %v1693_v15 = vtrunc.f32 %v1142_v31  ;;  %v1501_v19 = vtrunc.f32 %v2463_v25  ;;  %v1496_v24 = vcvt.f32.s32 %v1495_v12  ;;  %v160_v11 = vmul.f32 50.0, %v2468_v26 }
  0x81   :  { %1334 = vst.msk [vmem:[%s4731_s3 + $0x168] sm:$0xff] %vm307_vm1, %v1686_v45  ;;  %1333 = vst.msk [vmem:[%s4731_s3 + $0x160] sm:$0xff] %vm307_vm1, %v1684_v29  ;;  %v1688_v23 = vcvt.f32.s32 %v1687_v32  ;;  %v1141_v10 = vfloor.f32 %v158_v4  ;;  %v1144_v33 = vfloor.f32 %v161_v5  ;;  %v1499_v28 = vtrunc.f32 %v2468_v26  ;;  %622 = vrot.lane.b32.xlu1 %v2575_v22, %s1792_s18 }
  0x82   :  { %1042 = vst.msk [vmem:[%s4731_s3 + $0x178] sm:$0xff] %vm208_vm0, %v1494_v46  ;;  %1041 = vst.msk [vmem:[%s4731_s3 + $0x170] sm:$0xff] %vm208_vm0, %v1492_v17  ;;  %v1694_v45 = vcvt.f32.s32 %v1693_v15  ;;  %v1502_v46 = vcvt.f32.s32 %v1501_v19  ;;  %v1143_v38 = vfloor.f32 %v160_v11  ;;  %v163_v8 = vmul.f32 50.0, %v2492_v36  ;;  %620 = vrot.lane.b32.xlu0 %v2580_v27, %s1792_s18 }
  0x83   :  { %1044 = vst.msk [vmem:[%s4731_s3 + $0x188] sm:$0xff] %vm208_vm0, %v1498_v7  ;;  %1043 = vst.msk [vmem:[%s4731_s3 + $0x180] sm:$0xff] %vm208_vm0, %v1496_v24  ;;  %v1691_v29 = vtrunc.f32 %v1141_v10  ;;  %v1697_v17 = vtrunc.f32 %v1144_v33  ;;  %v1500_v31 = vcvt.f32.s32 %v1499_v28  ;;  %v162_v32 = vmul.f32 50.0, %v2497_v37 }
  0x84   :  { %356 = vst.msk [vmem:[%s4730_s1 + $0x180] sm:$0xff] %vm307_vm1, %v158_v4  ;;  %1336 = vst.msk [vmem:[%s4731_s3 + $0x178] sm:$0xff] %vm307_vm1, %v1690_v14  ;;  %v1503_v7 = vtrunc.f32 %v2497_v37  ;;  %v1695_v12 = vtrunc.f32 %v1143_v38  ;;  %v1506_v14 = vcvt.f32.s32 %v1505_v39  ;;  %v1146_v15 = vfloor.f32 %v163_v8 }
  0x85   :  { %359 = vst.msk [vmem:[%s4730_s1 + $0x198] sm:$0xff] %vm307_vm1, %v161_v5  ;;  %1335 = vst.msk [vmem:[%s4731_s3 + $0x170] sm:$0xff] %vm307_vm1, %v1688_v23  ;;  %v1692_v4 = vcvt.f32.s32 %v1691_v29  ;;  %v1698_v5 = vcvt.f32.s32 %v1697_v17  ;;  %v1145_v23 = vfloor.f32 %v162_v32  ;;  %v165_v24 = vmul.f32 50.0, %v2502_v44  ;;  %626 = vrot.lane.b32.xlu1 %v2609_v30, %s1792_s18 }
  0x86   :  { %358 = vst.msk [vmem:[%s4730_s1 + $0x190] sm:$0xff] %vm307_vm1, %v160_v11  ;;  %1338 = vst.msk [vmem:[%s4731_s3 + $0x188] sm:$0xff] %vm307_vm1, %v1694_v45  ;;  %v1504_v19 = vcvt.f32.s32 %v1503_v7  ;;  %v1696_v10 = vcvt.f32.s32 %v1695_v12  ;;  %v1701_v11 = vtrunc.f32 %v1146_v15  ;;  %v1509_v45 = vtrunc.f32 %v2502_v44 }
  0x87   :  { %1046 = vst.msk [vmem:[%s4731_s3 + $0x198] sm:$0xff] %vm208_vm0, %v1502_v46  ;;  %1045 = vst.msk [vmem:[%s4731_s3 + $0x190] sm:$0xff] %vm208_vm0, %v1500_v31  ;;  %v164_v46 = vmul.f32 50.0, %v2531_v58  ;;  %v1699_v43 = vtrunc.f32 %v1145_v23  ;;  %v1148_v51 = vfloor.f32 %v165_v24  ;;  %v1507_v33 = vtrunc.f32 %v2531_v58 }
  0x88   :  { %361 = vst.msk [vmem:[%s4730_s1 + $0x1a8] sm:$0xff] %vm307_vm1, %v163_v8  ;;  %360 = vst.msk [vmem:[%s4730_s1 + $0x1a0] sm:$0xff] %vm307_vm1, %v162_v32  ;;  %v167_v28 = vmul.f32 50.0, %v2536_v59  ;;  %v1702_v29 = vcvt.f32.s32 %v1701_v11  ;;  %v1510_v38 = vcvt.f32.s32 %v1509_v45  ;;  %v1513_v39 = vtrunc.f32 %v2536_v59 }
  0x89   :  { %1337 = vst.msk [vmem:[%s4731_s3 + $0x180] sm:$0xff] %vm307_vm1, %v1692_v4  ;;  %1340 = vst.msk [vmem:[%s4731_s3 + $0x198] sm:$0xff] %vm307_vm1, %v1698_v5  ;;  %v1147_v8 = vfloor.f32 %v164_v46  ;;  %v1700_v17 = vcvt.f32.s32 %v1699_v43  ;;  %v1705_v31 = vtrunc.f32 %v1148_v51  ;;  %v1508_v32 = vcvt.f32.s32 %v1507_v33 }
  0x8a   :  { %1048 = vst.msk [vmem:[%s4731_s3 + $0x1a8] sm:$0xff] %vm208_vm0, %v1506_v14  ;;  %1047 = vst.msk [vmem:[%s4731_s3 + $0x1a0] sm:$0xff] %vm208_vm0, %v1504_v19  ;;  %v1150_v7 = vfloor.f32 %v167_v28  ;;  %v1514_v12 = vcvt.f32.s32 %v1513_v39  ;;  %v166_v14 = vmul.f32 50.0, %v2541_v60  ;;  %v1511_v15 = vtrunc.f32 %v2541_v60 }
  0x8b   :  { %363 = vst.msk [vmem:[%s4730_s1 + $0x1b8] sm:$0xff] %vm307_vm1, %v165_v24  ;;  %1339 = vst.msk [vmem:[%s4731_s3 + $0x190] sm:$0xff] %vm307_vm1, %v1696_v10  ;;  %v1703_v4 = vtrunc.f32 %v1147_v8  ;;  %v1706_v52 = vcvt.f32.s32 %v1705_v31  ;;  %v169_v5 = vmul.f32 50.0, %v2575_v22  ;;  %v1517_v19 = vtrunc.f32 %v2575_v22  ;;  %v4781_v8 = vld [vmem:[#allocation2_spill] sm:$0xff] }
  0x8c   :  { %362 = vst.msk [vmem:[%s4730_s1 + $0x1b0] sm:$0xff] %vm307_vm1, %v164_v46  ;;  %365 = vst.msk [vmem:[%s4730_s1 + $0x1c8] sm:$0xff] %vm307_vm1, %v167_v28  ;;  %v1709_v53 = vtrunc.f32 %v1150_v7  ;;  %v1512_v24 = vcvt.f32.s32 %v1511_v15  ;;  %v1149_v10 = vfloor.f32 %v166_v14  ;;  %v168_v11 = vmul.f32 50.0, %v2580_v27  ;;  %624 = vrot.lane.b32.xlu0 %v4781_v8, %s1792_s18 }
  0x8d   :  { %1342 = vst.msk [vmem:[%s4731_s3 + $0x1a8] sm:$0xff] %vm307_vm1, %v1702_v29  ;;  %1341 = vst.msk [vmem:[%s4731_s3 + $0x1a0] sm:$0xff] %vm307_vm1, %v1700_v17  ;;  %v1704_v23 = vcvt.f32.s32 %v1703_v4  ;;  %v1518_v46 = vcvt.f32.s32 %v1517_v19  ;;  %v1152_v43 = vfloor.f32 %v169_v5  ;;  %v1515_v51 = vtrunc.f32 %v2580_v27 }
  0x8e   :  { %1050 = vst.msk [vmem:[%s4731_s3 + $0x1b8] sm:$0xff] %vm208_vm0, %v1510_v38  ;;  %1049 = vst.msk [vmem:[%s4731_s3 + $0x1b0] sm:$0xff] %vm208_vm0, %v1508_v32  ;;  %v1710_v45 = vcvt.f32.s32 %v1709_v53  ;;  %v1707_v33 = vtrunc.f32 %v1149_v10  ;;  %v1151_v63 = vfloor.f32 %v168_v11  ;;  %v171_v28 = vmul.f32 50.0, %v2609_v30 }
  0x8f   :  { %1052 = vst.msk [vmem:[%s4731_s3 + $0x1c8] sm:$0xff] %vm208_vm0, %v1514_v12  ;;  %1051 = vst.msk [vmem:[%s4731_s3 + $0x1c0] sm:$0xff] %vm208_vm0, %v1512_v24  ;;  %v1713_v29 = vtrunc.f32 %v1152_v43  ;;  %v1516_v38 = vcvt.f32.s32 %v1515_v51  ;;  %v170_v39 = vmul.f32 50.0, %v4781_v8  ;;  %v1519_v17 = vtrunc.f32 %v4781_v8  ;;  %v4783_v24 = vld [vmem:[#allocation4_spill] sm:$0xff] }
  0x90   :  { %364 = vst.msk [vmem:[%s4730_s1 + $0x1c0] sm:$0xff] %vm307_vm1, %v166_v14  ;;  %1344 = vst.msk [vmem:[%s4731_s3 + $0x1b8] sm:$0xff] %vm307_vm1, %v1706_v52  ;;  %v1708_v31 = vcvt.f32.s32 %v1707_v33  ;;  %v1711_v32 = vtrunc.f32 %v1151_v63  ;;  %v1522_v7 = vcvt.f32.s32 %v1521_v0  ;;  %v1154_v4 = vfloor.f32 %v171_v28  ;;  %v4782_v52 = vld [vmem:[#allocation3_spill] sm:$0xff]  ;;  %628 = vrot.lane.b32.xlu0 %v4783_v24, %s1792_s18 }
  0x91   :  { %367 = vst.msk [vmem:[%s4730_s1 + $0x1d8] sm:$0xff] %vm307_vm1, %v169_v5  ;;  %1343 = vst.msk [vmem:[%s4731_s3 + $0x1b0] sm:$0xff] %vm307_vm1, %v1704_v23  ;;  %v1714_v12 = vcvt.f32.s32 %v1713_v29  ;;  %v1520_v14 = vcvt.f32.s32 %v1519_v17  ;;  %v1153_v15 = vfloor.f32 %v170_v39  ;;  %v173_v53 = vmul.f32 50.0, %v4782_v52  ;;  %630 = vrot.lane.b32.xlu1 %v4782_v52, %s1792_s18 }
  0x92   :  { %366 = vst.msk [vmem:[%s4730_s1 + $0x1d0] sm:$0xff] %vm307_vm1, %v168_v11  ;;  %1346 = vst.msk [vmem:[%s4731_s3 + $0x1c8] sm:$0xff] %vm307_vm1, %v1710_v45  ;;  %v1712_v5 = vcvt.f32.s32 %v1711_v32  ;;  %v1717_v19 = vtrunc.f32 %v1154_v4  ;;  %v1525_v23 = vtrunc.f32 %v4782_v52  ;;  %v172_v10 = vmul.f32 50.0, %v4783_v24  ;;  %v4784_v45 = vld [vmem:[#allocation5_spill] sm:$0xff] }
  0x93   :  { %1054 = vst.msk [vmem:[%s4731_s3 + $0x1d8] sm:$0xff] %vm208_vm0, %v1518_v46  ;;  %1053 = vst.msk [vmem:[%s4731_s3 + $0x1d0] sm:$0xff] %vm208_vm0, %v1516_v38  ;;  %v1715_v1 = vtrunc.f32 %v1153_v15  ;;  %v1156_v20 = vfloor.f32 %v173_v53  ;;  %v1523_v11 = vtrunc.f32 %v4783_v24  ;;  %v175_v46 = vmul.f32 50.0, %v4784_v45 }
  0x94   :  { %369 = vst.msk [vmem:[%s4730_s1 + $0x1e8] sm:$0xff] %vm307_vm1, %v171_v28  ;;  %368 = vst.msk [vmem:[%s4730_s1 + $0x1e0] sm:$0xff] %vm307_vm1, %v170_v39  ;;  %v1718_v43 = vcvt.f32.s32 %v1717_v19  ;;  %v1526_v51 = vcvt.f32.s32 %v1525_v23  ;;  %v1155_v33 = vfloor.f32 %v172_v10  ;;  %v1529_v63 = vtrunc.f32 %v4784_v45 }
  0x95   :  { %1345 = vst.msk [vmem:[%s4731_s3 + $0x1c0] sm:$0xff] %vm307_vm1, %v1708_v31  ;;  %1348 = vst.msk [vmem:[%s4731_s3 + $0x1d8] sm:$0xff] %vm307_vm1, %v1714_v12  ;;  %v1716_v28 = vcvt.f32.s32 %v1715_v1  ;;  %v1721_v0 = vtrunc.f32 %v1156_v20  ;;  %v1524_v29 = vcvt.f32.s32 %v1523_v11  ;;  %v1158_v38 = vfloor.f32 %v175_v46  ;;  %v4785_v31 = vld [vmem:[#allocation6_spill] sm:$0xff]  ;;  %v4786_v11 = vld [vmem:[#allocation7_spill] sm:$0xff]  ;;  %634 = vrot.lane.b32.xlu1 %v4784_v45, %s1792_s18 }
  0x96   :  { %1056 = vst.msk [vmem:[%s4731_s3 + $0x1e8] sm:$0xff] %vm208_vm0, %v1522_v7  ;;  %1055 = vst.msk [vmem:[%s4731_s3 + $0x1e0] sm:$0xff] %vm208_vm0, %v1520_v14  ;;  %v1719_v39 = vtrunc.f32 %v1155_v33  ;;  %v1530_v17 = vcvt.f32.s32 %v1529_v63  ;;  %v174_v32 = vmul.f32 50.0, %v4785_v31  ;;  %v1527_v7 = vtrunc.f32 %v4785_v31  ;;  %v4787_v33 = vld [vmem:[#allocation8_spill] sm:$0xff]  ;;  %632 = vrot.lane.b32.xlu0 %v4785_v31, %s1792_s18 }
  0x97   :  { %371 = vst.msk [vmem:[%s4730_s1 + $0x1f8] sm:$0xff] %vm307_vm1, %v173_v53  ;;  %1347 = vst.msk [vmem:[%s4731_s3 + $0x1d0] sm:$0xff] %vm307_vm1, %v1712_v5  ;;  %v1722_v21 = vcvt.f32.s32 %v1721_v0  ;;  %v1725_v18 = vtrunc.f32 %v1158_v38  ;;  %v177_v4 = vmul.f32 50.0, %v2682_v9  ;;  %v1533_v12 = vtrunc.f32 %v2682_v9 }
  0x98   :  { %370 = vst.msk [vmem:[%s4730_s1 + $0x1f0] sm:$0xff] %vm307_vm1, %v172_v10  ;;  %373 = vst.msk [vmem:[%s4730_s1 + $0x208] sm:$0xff] %vm307_vm1, %v175_v46  ;;  %v1720_v14 = vcvt.f32.s32 %v1719_v39  ;;  %v1528_v15 = vcvt.f32.s32 %v1527_v7  ;;  %v1157_v53 = vfloor.f32 %v174_v32  ;;  %v176_v5 = vmul.f32 50.0, %v2687_v13 }
  0x99   :  { %1350 = vst.msk [vmem:[%s4731_s3 + $0x1e8] sm:$0xff] %vm307_vm1, %v1718_v43  ;;  %1349 = vst.msk [vmem:[%s4731_s3 + $0x1e0] sm:$0xff] %vm307_vm1, %v1716_v28  ;;  %v1726_v19 = vcvt.f32.s32 %v1725_v18  ;;  %v1534_v23 = vcvt.f32.s32 %v1533_v12  ;;  %v1160_v10 = vfloor.f32 %v177_v4  ;;  %v1531_v1 = vtrunc.f32 %v2687_v13  ;;  %638 = vrot.lane.b32.xlu1 %v2682_v9, %s1792_s18 }
  0x9a   :  { %1058 = vst.msk [vmem:[%s4731_s3 + $0x1f8] sm:$0xff] %vm208_vm0, %v1526_v51  ;;  %1057 = vst.msk [vmem:[%s4731_s3 + $0x1f0] sm:$0xff] %vm208_vm0, %v1524_v29  ;;  %v1723_v20 = vtrunc.f32 %v1157_v53  ;;  %v1159_v25 = vfloor.f32 %v176_v5  ;;  %v179_v46 = vmul.f32 50.0, %v4786_v11  ;;  %v1537_v26 = vtrunc.f32 %v4786_v11  ;;  %636 = vrot.lane.b32.xlu0 %v2687_v13, %s1792_s18 }
  0x9b   :  { %1060 = vst.msk [vmem:[%s4731_s3 + $0x208] sm:$0xff] %vm208_vm0, %v1530_v17  ;;  %1059 = vst.msk [vmem:[%s4731_s3 + $0x200] sm:$0xff] %vm208_vm0, %v1528_v15  ;;  %v1729_v43 = vtrunc.f32 %v1160_v10  ;;  %v1532_v51 = vcvt.f32.s32 %v1531_v1  ;;  %v178_v63 = vmul.f32 50.0, %v4787_v33  ;;  %v1535_v28 = vtrunc.f32 %v4787_v33  ;;  %v4789_v15 = vld [vmem:[#allocation10_spill] sm:$0xff] }
  0x9c   :  { %372 = vst.msk [vmem:[%s4730_s1 + $0x200] sm:$0xff] %vm307_vm1, %v174_v32  ;;  %1352 = vst.msk [vmem:[%s4731_s3 + $0x1f8] sm:$0xff] %vm307_vm1, %v1722_v21  ;;  %v1724_v0 = vcvt.f32.s32 %v1723_v20  ;;  %v1727_v29 = vtrunc.f32 %v1159_v25  ;;  %v1538_v38 = vcvt.f32.s32 %v1537_v26  ;;  %v1162_v39 = vfloor.f32 %v179_v46  ;;  %v4788_v21 = vld [vmem:[#allocation9_spill] sm:$0xff] }
  0x9d   :  { %375 = vst.msk [vmem:[%s4730_s1 + $0x218] sm:$0xff] %vm307_vm1, %v177_v4  ;;  %1351 = vst.msk [vmem:[%s4731_s3 + $0x1f0] sm:$0xff] %vm307_vm1, %v1720_v14  ;;  %v1730_v17 = vcvt.f32.s32 %v1729_v43  ;;  %v1536_v32 = vcvt.f32.s32 %v1535_v28  ;;  %v1161_v7 = vfloor.f32 %v178_v63  ;;  %v181_v18 = vmul.f32 50.0, %v4788_v21  ;;  %642 = vrot.lane.b32.xlu1 %v4786_v11, %s1792_s18 }
  0x9e   :  { %374 = vst.msk [vmem:[%s4730_s1 + $0x210] sm:$0xff] %vm307_vm1, %v176_v5  ;;  %1354 = vst.msk [vmem:[%s4731_s3 + $0x208] sm:$0xff] %vm307_vm1, %v1726_v19  ;;  %v1728_v4 = vcvt.f32.s32 %v1727_v29  ;;  %v1733_v12 = vtrunc.f32 %v1162_v39  ;;  %v1541_v14 = vtrunc.f32 %v4788_v21  ;;  %v180_v36 = vmul.f32 50.0, %v4789_v15  ;;  %v4790_v19 = vld [vmem:[#allocation11_spill] sm:$0xff]  ;;  %640 = vrot.lane.b32.xlu0 %v4787_v33, %s1792_s18 }
  0x9f   :  { %1062 = vst.msk [vmem:[%s4731_s3 + $0x218] sm:$0xff] %vm208_vm0, %v1534_v23  ;;  %1061 = vst.msk [vmem:[%s4731_s3 + $0x210] sm:$0xff] %vm208_vm0, %v1532_v51  ;;  %v1731_v37 = vtrunc.f32 %v1161_v7  ;;  %v1164_v53 = vfloor.f32 %v181_v18  ;;  %v1539_v5 = vtrunc.f32 %v4789_v15  ;;  %v183_v23 = vmul.f32 50.0, %v4790_v19 }
  0xa0   :  { %377 = vst.msk [vmem:[%s4730_s1 + $0x228] sm:$0xff] %vm307_vm1, %v179_v46  ;;  %376 = vst.msk [vmem:[%s4730_s1 + $0x220] sm:$0xff] %vm307_vm1, %v178_v63  ;;  %v1734_v10 = vcvt.f32.s32 %v1733_v12  ;;  %v1542_v1 = vcvt.f32.s32 %v1541_v14  ;;  %v1163_v20 = vfloor.f32 %v180_v36  ;;  %v1545_v25 = vtrunc.f32 %v4790_v19 }
  0xa1   :  { %1353 = vst.msk [vmem:[%s4731_s3 + $0x200] sm:$0xff] %vm307_vm1, %v1724_v0  ;;  %1356 = vst.msk [vmem:[%s4731_s3 + $0x218] sm:$0xff] %vm307_vm1, %v1730_v17  ;;  %v1732_v46 = vcvt.f32.s32 %v1731_v37  ;;  %v1737_v26 = vtrunc.f32 %v1164_v53  ;;  %v1540_v43 = vcvt.f32.s32 %v1539_v5  ;;  %v1166_v51 = vfloor.f32 %v183_v23  ;;  %v4791_v0 = vld [vmem:[#allocation12_spill] sm:$0xff]  ;;  %646 = vrot.lane.b32.xlu1 %v4788_v21, %s1792_s18 }
  0xa2   :  { %1064 = vst.msk [vmem:[%s4731_s3 + $0x228] sm:$0xff] %vm208_vm0, %v1538_v38  ;;  %1063 = vst.msk [vmem:[%s4731_s3 + $0x220] sm:$0xff] %vm208_vm0, %v1536_v32  ;;  %v1735_v63 = vtrunc.f32 %v1163_v20  ;;  %v1546_v28 = vcvt.f32.s32 %v1545_v25  ;;  %v182_v29 = vmul.f32 50.0, %v4791_v0  ;;  %v1543_v38 = vtrunc.f32 %v4791_v0  ;;  %v4794_v25 = vld [vmem:[#allocation15_spill] sm:$0xff]  ;;  %644 = vrot.lane.b32.xlu0 %v4789_v15, %s1792_s18 }
  0xa3   :  { %379 = vst.msk [vmem:[%s4730_s1 + $0x238] sm:$0xff] %vm307_vm1, %v181_v18  ;;  %1355 = vst.msk [vmem:[%s4731_s3 + $0x210] sm:$0xff] %vm307_vm1, %v1728_v4  ;;  %v1738_v44 = vcvt.f32.s32 %v1737_v26  ;;  %v1741_v58 = vtrunc.f32 %v1166_v51  ;;  %v185_v39 = vmul.f32 50.0, %v2795_v57  ;;  %v1549_v17 = vtrunc.f32 %v2795_v57  ;;  %v4792_v4 = vld [vmem:[#allocation13_spill] sm:$0xff]  ;;  %v505_v51 = vpop.permute.xlu0 %504 }
  0xa4   :  { %378 = vst.msk [vmem:[%s4730_s1 + $0x230] sm:$0xff] %vm307_vm1, %v180_v36  ;;  %381 = vst.msk [vmem:[%s4730_s1 + $0x248] sm:$0xff] %vm307_vm1, %v183_v23  ;;  %v1736_v32 = vcvt.f32.s32 %v1735_v63  ;;  %v1544_v7 = vcvt.f32.s32 %v1543_v38  ;;  %v1165_v18 = vfloor.f32 %v182_v29  ;;  %v184_v12 = vmul.f32 50.0, %v4792_v4  ;;  %v4793_v23 = vld [vmem:[#allocation14_spill] sm:$0xff] }
  0xa5   :  { %1358 = vst.msk [vmem:[%s4731_s3 + $0x228] sm:$0xff] %vm307_vm1, %v1734_v10  ;;  %1357 = vst.msk [vmem:[%s4731_s3 + $0x220] sm:$0xff] %vm307_vm1, %v1732_v46  ;;  %v1742_v14 = vcvt.f32.s32 %v1741_v58  ;;  %v1550_v36 = vcvt.f32.s32 %v1549_v17  ;;  %v1168_v37 = vfloor.f32 %v185_v39  ;;  %v1547_v53 = vtrunc.f32 %v4792_v4  ;;  %v4795_v17 = vld [vmem:[#allocation16_spill] sm:$0xff]  ;;  %650 = vrot.lane.b32.xlu1 %v4790_v19, %s1792_s18 }
  0xa6   :  { %1066 = vst.msk [vmem:[%s4731_s3 + $0x238] sm:$0xff] %vm208_vm0, %v1542_v1  ;;  %1065 = vst.msk [vmem:[%s4731_s3 + $0x230] sm:$0xff] %vm208_vm0, %v1540_v43  ;;  %v1739_v5 = vtrunc.f32 %v1165_v18  ;;  %v1167_v59 = vfloor.f32 %v184_v12  ;;  %v187_v10 = vmul.f32 50.0, %v4793_v23  ;;  %v1553_v60 = vtrunc.f32 %v4793_v23  ;;  %v509_v43 = vpop.permute.xlu1 %508  ;;  %648 = vrot.lane.b32.xlu0 %v4791_v0, %s1792_s18 }
  0xa7   :  { %1068 = vst.msk [vmem:[%s4731_s3 + $0x248] sm:$0xff] %vm208_vm0, %v1546_v28  ;;  %1067 = vst.msk [vmem:[%s4731_s3 + $0x240] sm:$0xff] %vm208_vm0, %v1544_v7  ;;  %v1745_v1 = vtrunc.f32 %v1168_v37  ;;  %v1548_v20 = vcvt.f32.s32 %v1547_v53  ;;  %v186_v46 = vmul.f32 50.0, %v4794_v25  ;;  %v1551_v26 = vtrunc.f32 %v4794_v25 }
  0xa8   :  { %380 = vst.msk [vmem:[%s4730_s1 + $0x240] sm:$0xff] %vm307_vm1, %v182_v29  ;;  %1360 = vst.msk [vmem:[%s4731_s3 + $0x238] sm:$0xff] %vm307_vm1, %v1738_v44  ;;  %v1740_v63 = vcvt.f32.s32 %v1739_v5  ;;  %v1743_v28 = vtrunc.f32 %v1167_v59  ;;  %v1554_v29 = vcvt.f32.s32 %v1553_v60  ;;  %v1170_v38 = vfloor.f32 %v187_v10  ;;  %v507_v59 = vpop.permute.xlu0 %506 }
  0xa9   :  { %383 = vst.msk [vmem:[%s4730_s1 + $0x258] sm:$0xff] %vm307_vm1, %v185_v39  ;;  %1359 = vst.msk [vmem:[%s4731_s3 + $0x230] sm:$0xff] %vm307_vm1, %v1736_v32  ;;  %v1746_v44 = vcvt.f32.s32 %v1745_v1  ;;  %v1552_v58 = vcvt.f32.s32 %v1551_v26  ;;  %v1169_v39 = vfloor.f32 %v186_v46  ;;  %v189_v32 = vmul.f32 50.0, %v4795_v17  ;;  %654 = vrot.lane.b32.xlu1 %v2795_v57, %s1792_s18 }
  0xaa   :  { %382 = vst.msk [vmem:[%s4730_s1 + $0x250] sm:$0xff] %vm307_vm1, %v184_v12  ;;  %1362 = vst.msk [vmem:[%s4731_s3 + $0x248] sm:$0xff] %vm307_vm1, %v1742_v14  ;;  %v1744_v7 = vcvt.f32.s32 %v1743_v28  ;;  %v1749_v18 = vtrunc.f32 %v1170_v38  ;;  %v1557_v12 = vtrunc.f32 %v4795_v17  ;;  %v4796_v14 = vld [vmem:[#allocation17_spill] sm:$0xff]  ;;  %v191_v53 = vmul.f32 50.0, %v2905_v2  ;;  %v511_v5 = vpop.permute.xlu1 %510  ;;  %652 = vrot.lane.b32.xlu0 %v4792_v4, %s1792_s18 }
  0xab   :  { %1070 = vst.msk [vmem:[%s4731_s3 + $0x258] sm:$0xff] %vm208_vm0, %v1550_v36  ;;  %1069 = vst.msk [vmem:[%s4731_s3 + $0x250] sm:$0xff] %vm208_vm0, %v1548_v20  ;;  %v188_v36 = vmul.f32 50.0, %v4796_v14  ;;  %v1747_v22 = vtrunc.f32 %v1169_v39  ;;  %v1172_v27 = vfloor.f32 %v189_v32  ;;  %v1555_v37 = vtrunc.f32 %v4796_v14 }
  0xac   :  { %385 = vst.msk [vmem:[%s4730_s1 + $0x268] sm:$0xff] %vm307_vm1, %v187_v10  ;;  %384 = vst.msk [vmem:[%s4730_s1 + $0x260] sm:$0xff] %vm307_vm1, %v186_v46  ;;  %v1750_v10 = vcvt.f32.s32 %v1749_v18  ;;  %v1558_v60 = vcvt.f32.s32 %v1557_v12  ;;  %v1561_v20 = vtrunc.f32 %v2905_v2  ;;  %v1559_v38 = vtrunc.f32 %v2910_v6 }
  0xad   :  { %801 = vst.msk [vmem:[%s4732_s2 + $0x10] sm:$0xff] %vm798_vm2, %v509_v43  ;;  %799 = vst.msk [vmem:[%s4732_s2] sm:$0xff] %vm798_vm2, %v505_v51  ;;  %v1171_v1 = vfloor.f32 %v188_v36  ;;  %v1748_v46 = vcvt.f32.s32 %v1747_v22  ;;  %v1753_v26 = vtrunc.f32 %v1172_v27  ;;  %v1556_v43 = vcvt.f32.s32 %v1555_v37  ;;  %658 = vrot.lane.b32.xlu1 %v4793_v23, %s1792_s18 }
  0xae   :  { %1361 = vst.msk [vmem:[%s4731_s3 + $0x240] sm:$0xff] %vm307_vm1, %v1740_v63  ;;  %1364 = vst.msk [vmem:[%s4731_s3 + $0x258] sm:$0xff] %vm307_vm1, %v1746_v44  ;;  %v1174_v51 = vfloor.f32 %v191_v53  ;;  %v1562_v28 = vcvt.f32.s32 %v1561_v20  ;;  %v193_v44 = vmul.f32 50.0, %v2966_v50  ;;  %v515_v39 = vpop.permute.xlu1 %514  ;;  %v1560_v18 = vcvt.f32.s32 %v1559_v38  ;;  %656 = vrot.lane.b32.xlu0 %v4794_v25, %s1792_s18 }
  0xaf   :  { %1072 = vst.msk [vmem:[%s4731_s3 + $0x268] sm:$0xff] %vm208_vm0, %v1554_v29  ;;  %1071 = vst.msk [vmem:[%s4731_s3 + $0x260] sm:$0xff] %vm208_vm0, %v1552_v58  ;;  %v1751_v63 = vtrunc.f32 %v1171_v1  ;;  %v190_v29 = vmul.f32 50.0, %v2910_v6  ;;  %v1754_v30 = vcvt.f32.s32 %v1753_v26  ;;  %v1565_v58 = vtrunc.f32 %v2966_v50 }
  0xb0   :  { %387 = vst.msk [vmem:[%s4730_s1 + $0x278] sm:$0xff] %vm307_vm1, %v189_v32  ;;  %1363 = vst.msk [vmem:[%s4731_s3 + $0x250] sm:$0xff] %vm307_vm1, %v1744_v7  ;;  %v1757_v8 = vtrunc.f32 %v1174_v51  ;;  %v513_v32 = vpop.permute.xlu0 %512  ;;  %v1176_v37 = vfloor.f32 %v193_v44  ;;  %v1569_v24 = vtrunc.f32 %v3028_v35  ;;  %v194_v1 = vmul.f32 50.0, %v3033_v16 }
  0xb1   :  { %386 = vst.msk [vmem:[%s4730_s1 + $0x270] sm:$0xff] %vm307_vm1, %v188_v36  ;;  %389 = vst.msk [vmem:[%s4730_s1 + $0x288] sm:$0xff] %vm307_vm1, %v191_v53  ;;  %v1752_v7 = vcvt.f32.s32 %v1751_v63  ;;  %v1173_v12 = vfloor.f32 %v190_v29  ;;  %v192_v36 = vmul.f32 50.0, %v2971_v34  ;;  %v1566_v27 = vcvt.f32.s32 %v1565_v58  ;;  %662 = vrot.lane.b32.xlu1 %v4795_v17, %s1792_s18 }
  0xb2   :  { %802 = vst.msk [vmem:[%s4732_s2 + $0x18] sm:$0xff] %vm798_vm2, %v511_v5  ;;  %800 = vst.msk [vmem:[%s4732_s2 + $0x8] sm:$0xff] %vm798_vm2, %v507_v59  ;;  %v1758_v22 = vcvt.f32.s32 %v1757_v8  ;;  %v1563_v53 = vtrunc.f32 %v2971_v34  ;;  %v195_v59 = vmul.f32 50.0, %v3028_v35  ;;  %v1567_v20 = vtrunc.f32 %v3033_v16  ;;  %660 = vrot.lane.b32.xlu0 %v4796_v14, %s1792_s18 }
  0xb3   :  { %1366 = vst.msk [vmem:[%s4731_s3 + $0x268] sm:$0xff] %vm307_vm1, %v1750_v10  ;;  %1365 = vst.msk [vmem:[%s4731_s3 + $0x260] sm:$0xff] %vm307_vm1, %v1748_v46  ;;  %v1755_v5 = vtrunc.f32 %v1173_v12  ;;  %v1175_v52 = vfloor.f32 %v192_v36  ;;  %v1761_v10 = vtrunc.f32 %v1176_v37  ;;  %v519_v46 = vpop.permute.xlu1 %518  ;;  %v1570_v63 = vcvt.f32.s32 %v1569_v24 }
  0xb4   :  { %1074 = vst.msk [vmem:[%s4731_s3 + $0x278] sm:$0xff] %vm208_vm0, %v1558_v60  ;;  %1073 = vst.msk [vmem:[%s4731_s3 + $0x270] sm:$0xff] %vm208_vm0, %v1556_v43  ;;  %v1564_v60 = vcvt.f32.s32 %v1563_v53  ;;  %v517_v26 = vpop.permute.xlu0 %516  ;;  %v1568_v38 = vcvt.f32.s32 %v1567_v20  ;;  %v197_v8 = vmul.f32 50.0, %v3089_v40  ;;  %v1577_v53 = vtrunc.f32 %v3150_v41 }
  0xb5   :  { %1076 = vst.msk [vmem:[%s4731_s3 + $0x288] sm:$0xff] %vm208_vm0, %v1562_v28  ;;  %1075 = vst.msk [vmem:[%s4731_s3 + $0x280] sm:$0xff] %vm208_vm0, %v1560_v18  ;;  %v1756_v43 = vcvt.f32.s32 %v1755_v5  ;;  %v1759_v51 = vtrunc.f32 %v1175_v52  ;;  %v1178_v28 = vfloor.f32 %v195_v59  ;;  %v199_v18 = vmul.f32 50.0, %v3150_v41  ;;  %666 = vrot.lane.b32.xlu1 %v2905_v2, %s1792_s18 }
  0xb6   :  { %388 = vst.msk [vmem:[%s4730_s1 + $0x280] sm:$0xff] %vm307_vm1, %v190_v29  ;;  %1368 = vst.msk [vmem:[%s4731_s3 + $0x278] sm:$0xff] %vm307_vm1, %v1754_v30  ;;  %v1762_v29 = vcvt.f32.s32 %v1761_v10  ;;  %v1177_v30 = vfloor.f32 %v194_v1  ;;  %v1180_v31 = vfloor.f32 %v197_v8  ;;  %v1575_v20 = vtrunc.f32 %v3155_v49  ;;  %664 = vrot.lane.b32.xlu0 %v2910_v6, %s1792_s18 }
  0xb7   :  { %804 = vst.msk [vmem:[%s4732_s2 + $0x28] sm:$0xff] %vm798_vm2, %v515_v39  ;;  %803 = vst.msk [vmem:[%s4732_s2 + $0x20] sm:$0xff] %vm798_vm2, %v513_v32  ;;  %v1765_v58 = vtrunc.f32 %v1178_v28  ;;  %v1573_v39 = vtrunc.f32 %v3089_v40  ;;  %v196_v32 = vmul.f32 50.0, %v3094_v48  ;;  %v523_v12 = vpop.permute.xlu1 %522  ;;  %v1182_v24 = vfloor.f32 %v199_v18 }
  0xb8   :  { %391 = vst.msk [vmem:[%s4730_s1 + $0x298] sm:$0xff] %vm307_vm1, %v193_v44  ;;  %1367 = vst.msk [vmem:[%s4731_s3 + $0x270] sm:$0xff] %vm307_vm1, %v1752_v7  ;;  %v1760_v44 = vcvt.f32.s32 %v1759_v51  ;;  %v1763_v45 = vtrunc.f32 %v1177_v30  ;;  %v1571_v7 = vtrunc.f32 %v3094_v48  ;;  %v1769_v52 = vtrunc.f32 %v1180_v31 }
  0xb9   :  { %390 = vst.msk [vmem:[%s4730_s1 + $0x290] sm:$0xff] %vm307_vm1, %v192_v36  ;;  %1370 = vst.msk [vmem:[%s4731_s3 + $0x288] sm:$0xff] %vm307_vm1, %v1758_v22  ;;  %v521_v36 = vpop.permute.xlu0 %520  ;;  %v1766_v22 = vcvt.f32.s32 %v1765_v58  ;;  %v1179_v37 = vfloor.f32 %v196_v32  ;;  %v1773_v13 = vtrunc.f32 %v1182_v24  ;;  %v1576_v28 = vcvt.f32.s32 %v1575_v20  ;;  %670 = vrot.lane.b32.xlu1 %v2966_v50, %s1792_s18 }
  0xba   :  { %1078 = vst.msk [vmem:[%s4731_s3 + $0x298] sm:$0xff] %vm208_vm0, %v1566_v27  ;;  %1077 = vst.msk [vmem:[%s4731_s3 + $0x290] sm:$0xff] %vm208_vm0, %v1564_v60  ;;  %v1574_v27 = vcvt.f32.s32 %v1573_v39  ;;  %v1764_v5 = vcvt.f32.s32 %v1763_v45  ;;  %v1578_v60 = vcvt.f32.s32 %v1577_v53  ;;  %v1770_v9 = vcvt.f32.s32 %v1769_v52  ;;  %668 = vrot.lane.b32.xlu0 %v2971_v34, %s1792_s18 }
  0xbb   :  { %393 = vst.msk [vmem:[%s4730_s1 + $0x2a8] sm:$0xff] %vm307_vm1, %v195_v59  ;;  %392 = vst.msk [vmem:[%s4730_s1 + $0x2a0] sm:$0xff] %vm307_vm1, %v194_v1  ;;  %v1572_v59 = vcvt.f32.s32 %v1571_v7  ;;  %v1767_v10 = vtrunc.f32 %v1179_v37  ;;  %v198_v1 = vmul.f32 50.0, %v3155_v49  ;;  %v1774_v30 = vcvt.f32.s32 %v1773_v13 }
  0xbc   :  { %806 = vst.msk [vmem:[%s4732_s2 + $0x38] sm:$0xff] %vm798_vm2, %v519_v46  ;;  %805 = vst.msk [vmem:[%s4732_s2 + $0x30] sm:$0xff] %vm798_vm2, %v517_v26  ;;  %v201_v46 = vmul.f32 50.0, %v3212_v42  ;;  %v1581_v26 = vtrunc.f32 %v3212_v42  ;;  %v1579_v58 = vtrunc.f32 %v3217_v47  ;;  %v1585_v33 = vtrunc.f32 %v3273_v54 }
  0xbd   :  { %1369 = vst.msk [vmem:[%s4731_s3 + $0x280] sm:$0xff] %vm307_vm1, %v1756_v43  ;;  %1372 = vst.msk [vmem:[%s4731_s3 + $0x298] sm:$0xff] %vm307_vm1, %v1762_v29  ;;  %v527_v43 = vpop.permute.xlu1 %526  ;;  %v525_v51 = vpop.permute.xlu0 %524  ;;  %v1181_v29 = vfloor.f32 %v198_v1  ;;  %v202_v7 = vmul.f32 50.0, %v3278_v62  ;;  %v205_v24 = vmul.f32 50.0, %v3334_v55  ;;  %v204_v20 = vmul.f32 50.0, %v3339_v3  ;;  %674 = vrot.lane.b32.xlu1 %v3028_v35, %s1792_s18 }
  0xbe   :  { %1080 = vst.msk [vmem:[%s4731_s3 + $0x2a8] sm:$0xff] %vm208_vm0, %v1570_v63  ;;  %1079 = vst.msk [vmem:[%s4731_s3 + $0x2a0] sm:$0xff] %vm208_vm0, %v1568_v38  ;;  %v1768_v63 = vcvt.f32.s32 %v1767_v10  ;;  %v200_v38 = vmul.f32 50.0, %v3217_v47  ;;  %v1580_v31 = vcvt.f32.s32 %v1579_v58  ;;  %v1586_v37 = vcvt.f32.s32 %v1585_v33  ;;  %672 = vrot.lane.b32.xlu0 %v3033_v16, %s1792_s18 }
  0xbf   :  { %395 = vst.msk [vmem:[%s4730_s1 + $0x2b8] sm:$0xff] %vm307_vm1, %v197_v8  ;;  %1371 = vst.msk [vmem:[%s4731_s3 + $0x290] sm:$0xff] %vm307_vm1, %v1760_v44  ;;  %v1582_v8 = vcvt.f32.s32 %v1581_v26  ;;  %v1184_v44 = vfloor.f32 %v201_v46  ;;  %v1771_v39 = vtrunc.f32 %v1181_v29  ;;  %v1188_v15 = vfloor.f32 %v205_v24 }
  0xc0   :  { %394 = vst.msk [vmem:[%s4730_s1 + $0x2b0] sm:$0xff] %vm307_vm1, %v196_v32  ;;  %397 = vst.msk [vmem:[%s4730_s1 + $0x2c8] sm:$0xff] %vm307_vm1, %v199_v18  ;;  %v1183_v11 = vfloor.f32 %v200_v38  ;;  %v203_v32 = vmul.f32 50.0, %v3273_v54  ;;  %v1583_v18 = vtrunc.f32 %v3278_v62  ;;  %v207_v13 = vmul.f32 50.0, %v3396_v56 }
  0xc1   :  { %808 = vst.msk [vmem:[%s4732_s2 + $0x48] sm:$0xff] %vm798_vm2, %v523_v12  ;;  %807 = vst.msk [vmem:[%s4732_s2 + $0x40] sm:$0xff] %vm798_vm2, %v521_v36  ;;  %v1777_v45 = vtrunc.f32 %v1184_v44  ;;  %v531_v12 = vpop.permute.xlu1 %530  ;;  %v529_v36 = vpop.permute.xlu0 %528  ;;  %678 = vrot.lane.b32.xlu1 %v3089_v40, %s1792_s18 }
  0xc2   :  { %1374 = vst.msk [vmem:[%s4731_s3 + $0x2a8] sm:$0xff] %vm307_vm1, %v1766_v22  ;;  %1373 = vst.msk [vmem:[%s4731_s3 + $0x2a0] sm:$0xff] %vm307_vm1, %v1764_v5  ;;  %v1772_v22 = vcvt.f32.s32 %v1771_v39  ;;  %v1186_v53 = vfloor.f32 %v203_v32  ;;  %v1584_v52 = vcvt.f32.s32 %v1583_v18  ;;  %v206_v39 = vmul.f32 50.0, %v3401_v61  ;;  %676 = vrot.lane.b32.xlu0 %v3094_v48, %s1792_s18 }
  0xc3   :  { %1082 = vst.msk [vmem:[%s4731_s3 + $0x2b8] sm:$0xff] %vm208_vm0, %v1574_v27  ;;  %1081 = vst.msk [vmem:[%s4731_s3 + $0x2b0] sm:$0xff] %vm208_vm0, %v1572_v59  ;;  %v1775_v27 = vtrunc.f32 %v1183_v11  ;;  %v1778_v5 = vcvt.f32.s32 %v1777_v45  ;;  %v1185_v59 = vfloor.f32 %v202_v7  ;;  %v1591_v11 = vtrunc.f32 %v3401_v61 }
  0xc4   :  { %1084 = vst.msk [vmem:[%s4731_s3 + $0x2c8] sm:$0xff] %vm208_vm0, %v1578_v60  ;;  %1083 = vst.msk [vmem:[%s4731_s3 + $0x2c0] sm:$0xff] %vm208_vm0, %v1576_v28  ;;  %v1781_v60 = vtrunc.f32 %v1186_v53  ;;  %v1593_v28 = vtrunc.f32 %v3396_v56 }
  0xc5   :  { %396 = vst.msk [vmem:[%s4730_s1 + $0x2c0] sm:$0xff] %vm307_vm1, %v198_v1  ;;  %1376 = vst.msk [vmem:[%s4731_s3 + $0x2b8] sm:$0xff] %vm307_vm1, %v1770_v9  ;;  %v1776_v10 = vcvt.f32.s32 %v1775_v27  ;;  %v1589_v1 = vtrunc.f32 %v3334_v55  ;;  %v1779_v21 = vtrunc.f32 %v1185_v59  ;;  %v1587_v9 = vtrunc.f32 %v3339_v3  ;;  %v533_v26 = vpop.permute.xlu0 %532  ;;  %682 = vrot.lane.b32.xlu1 %v3150_v41, %s1792_s18 }
  0xc6   :  { %810 = vst.msk [vmem:[%s4732_s2 + $0x58] sm:$0xff] %vm798_vm2, %v527_v43  ;;  %809 = vst.msk [vmem:[%s4732_s2 + $0x50] sm:$0xff] %vm798_vm2, %v525_v51  ;;  %v1782_v43 = vcvt.f32.s32 %v1781_v60  ;;  %v1594_v58 = vcvt.f32.s32 %v1593_v28  ;;  %680 = vrot.lane.b32.xlu0 %v3155_v49, %s1792_s18 }
  0xc7   :  { %399 = vst.msk [vmem:[%s4730_s1 + $0x2d8] sm:$0xff] %vm307_vm1, %v201_v46  ;;  %1375 = vst.msk [vmem:[%s4731_s3 + $0x2b0] sm:$0xff] %vm307_vm1, %v1768_v63  ;;  %v535_v46 = vpop.permute.xlu1 %534  ;;  %v1590_v51 = vcvt.f32.s32 %v1589_v1  ;;  %v1187_v63 = vfloor.f32 %v204_v20  ;;  %v1780_v29 = vcvt.f32.s32 %v1779_v21 }
  0xc8   :  { %398 = vst.msk [vmem:[%s4730_s1 + $0x2d0] sm:$0xff] %vm307_vm1, %v200_v38  ;;  %1378 = vst.msk [vmem:[%s4731_s3 + $0x2c8] sm:$0xff] %vm307_vm1, %v1774_v30  ;;  %v1785_v38 = vtrunc.f32 %v1188_v15  ;;  %v1588_v30 = vcvt.f32.s32 %v1587_v9 }
  0xc9   :  { %1086 = vst.msk [vmem:[%s4731_s3 + $0x2d8] sm:$0xff] %vm208_vm0, %v1582_v8  ;;  %1085 = vst.msk [vmem:[%s4731_s3 + $0x2d0] sm:$0xff] %vm208_vm0, %v1580_v31  ;;  %v1190_v8 = vfloor.f32 %v207_v13  ;;  %v1783_v44 = vtrunc.f32 %v1187_v63  ;;  %v537_v33 = vpop.permute.xlu0 %536  ;;  %v1592_v31 = vcvt.f32.s32 %v1591_v11  ;;  %686 = vrot.lane.b32.xlu1 %v3212_v42, %s1792_s18 }
  0xca   :  { %401 = vst.msk [vmem:[%s4730_s1 + $0x2e8] sm:$0xff] %vm307_vm1, %v203_v32  ;;  %400 = vst.msk [vmem:[%s4730_s1 + $0x2e0] sm:$0xff] %vm307_vm1, %v202_v7  ;;  %v1786_v19 = vcvt.f32.s32 %v1785_v38  ;;  %v1189_v7 = vfloor.f32 %v206_v39  ;;  %684 = vrot.lane.b32.xlu0 %v3217_v47, %s1792_s18 }
  0xcb   :  { %812 = vst.msk [vmem:[%s4732_s2 + $0x68] sm:$0xff] %vm798_vm2, %v531_v12  ;;  %811 = vst.msk [vmem:[%s4732_s2 + $0x60] sm:$0xff] %vm798_vm2, %v529_v36  ;;  %v1789_v0 = vtrunc.f32 %v1190_v8  ;;  %v539_v32 = vpop.permute.xlu1 %538  ;;  %v1784_v45 = vcvt.f32.s32 %v1783_v44 }
  0xcc   :  { %1377 = vst.msk [vmem:[%s4731_s3 + $0x2c0] sm:$0xff] %vm307_vm1, %v1772_v22  ;;  %1380 = vst.msk [vmem:[%s4731_s3 + $0x2d8] sm:$0xff] %vm307_vm1, %v1778_v5  ;;  %v1787_v12 = vtrunc.f32 %v1189_v7 }
  0xcd   :  { %1088 = vst.msk [vmem:[%s4731_s3 + $0x2e8] sm:$0xff] %vm208_vm0, %v1586_v37  ;;  %1087 = vst.msk [vmem:[%s4731_s3 + $0x2e0] sm:$0xff] %vm208_vm0, %v1584_v52  ;;  %v1790_v18 = vcvt.f32.s32 %v1789_v0  ;;  %v541_v36 = vpop.permute.xlu0 %540  ;;  %690 = vrot.lane.b32.xlu1 %v3273_v54, %s1792_s18 }
  0xce   :  { %403 = vst.msk [vmem:[%s4730_s1 + $0x2f8] sm:$0xff] %vm307_vm1, %v205_v24  ;;  %1379 = vst.msk [vmem:[%s4731_s3 + $0x2d0] sm:$0xff] %vm307_vm1, %v1776_v10  ;;  %v1788_v22 = vcvt.f32.s32 %v1787_v12  ;;  %688 = vrot.lane.b32.xlu0 %v3278_v62, %s1792_s18 }
  0xcf   :  { %402 = vst.msk [vmem:[%s4730_s1 + $0x2f0] sm:$0xff] %vm307_vm1, %v204_v20  ;;  %405 = vst.msk [vmem:[%s4730_s1 + $0x308] sm:$0xff] %vm307_vm1, %v207_v13  ;;  %v543_v57 = vpop.permute.xlu1 %542 }
  0xd0   :  { %814 = vst.msk [vmem:[%s4732_s2 + $0x78] sm:$0xff] %vm798_vm2, %v535_v46  ;;  %813 = vst.msk [vmem:[%s4732_s2 + $0x70] sm:$0xff] %vm798_vm2, %v533_v26 }
  0xd1   :  { %1382 = vst.msk [vmem:[%s4731_s3 + $0x2e8] sm:$0xff] %vm307_vm1, %v1782_v43  ;;  %1381 = vst.msk [vmem:[%s4731_s3 + $0x2e0] sm:$0xff] %vm307_vm1, %v1780_v29  ;;  %v545_v27 = vpop.permute.xlu0 %544  ;;  %694 = vrot.lane.b32.xlu1 %v3334_v55, %s1792_s18 }
  0xd2   :  { %1090 = vst.msk [vmem:[%s4731_s3 + $0x2f8] sm:$0xff] %vm208_vm0, %v1590_v51  ;;  %1089 = vst.msk [vmem:[%s4731_s3 + $0x2f0] sm:$0xff] %vm208_vm0, %v1588_v30  ;;  %692 = vrot.lane.b32.xlu0 %v3339_v3, %s1792_s18 }
  0xd3   :  { %1092 = vst.msk [vmem:[%s4731_s3 + $0x308] sm:$0xff] %vm208_vm0, %v1594_v58  ;;  %1091 = vst.msk [vmem:[%s4731_s3 + $0x300] sm:$0xff] %vm208_vm0, %v1592_v31  ;;  %v547_v4 = vpop.permute.xlu1 %546 }
  0xd4   :  { %404 = vst.msk [vmem:[%s4730_s1 + $0x300] sm:$0xff] %vm307_vm1, %v206_v39  ;;  %1384 = vst.msk [vmem:[%s4731_s3 + $0x2f8] sm:$0xff] %vm307_vm1, %v1786_v19 }
  0xd5   :  { %816 = vst.msk [vmem:[%s4732_s2 + $0x88] sm:$0xff] %vm798_vm2, %v539_v32  ;;  %815 = vst.msk [vmem:[%s4732_s2 + $0x80] sm:$0xff] %vm798_vm2, %v537_v33  ;;  %v549_v25 = vpop.permute.xlu0 %548  ;;  %698 = vrot.lane.b32.xlu1 %v3396_v56, %s1792_s18 }
  0xd6   :  { %1383 = vst.msk [vmem:[%s4731_s3 + $0x2f0] sm:$0xff] %vm307_vm1, %v1784_v45  ;;  %1386 = vst.msk [vmem:[%s4731_s3 + $0x308] sm:$0xff] %vm307_vm1, %v1790_v18  ;;  %696 = vrot.lane.b32.xlu0 %v3401_v61, %s1792_s18 }
  0xd7   :  { %818 = vst.msk [vmem:[%s4732_s2 + $0x98] sm:$0xff] %vm798_vm2, %v543_v57  ;;  %817 = vst.msk [vmem:[%s4732_s2 + $0x90] sm:$0xff] %vm798_vm2, %v541_v36  ;;  %v551_v23 = vpop.permute.xlu1 %550 }
  0xd8   :  { %1385 = vst.msk [vmem:[%s4731_s3 + $0x300] sm:$0xff] %vm307_vm1, %v1788_v22 }
  0xd9   :  { %820 = vst.msk [vmem:[%s4732_s2 + $0xa8] sm:$0xff] %vm798_vm2, %v547_v4  ;;  %819 = vst.msk [vmem:[%s4732_s2 + $0xa0] sm:$0xff] %vm798_vm2, %v545_v27  ;;  %v553_v14 = vpop.permute.xlu0 %552 }
  0xda   :  { %822 = vst.msk [vmem:[%s4732_s2 + $0xb8] sm:$0xff] %vm798_vm2, %v551_v23  ;;  %821 = vst.msk [vmem:[%s4732_s2 + $0xb0] sm:$0xff] %vm798_vm2, %v549_v25 }
  0xdb   :  { %v555_v17 = vpop.permute.xlu1 %554  ;;  %823 = vst.msk [vmem:[%s4732_s2 + $0xc0] sm:$0xff] %vm798_vm2, %v553_v14 }
  0xdc   :  { %824 = vst.msk [vmem:[%s4732_s2 + $0xc8] sm:$0xff] %vm798_vm2, %v555_v17 }
  0xdd   :  { %v557_v6 = vpop.permute.xlu0 %556 }
  0xde   :  { %825 = vst.msk [vmem:[%s4732_s2 + $0xd0] sm:$0xff] %vm798_vm2, %v557_v6 }
  0xdf   :  { %v559_v2 = vpop.permute.xlu1 %558 }
  0xe0   :  { %826 = vst.msk [vmem:[%s4732_s2 + $0xd8] sm:$0xff] %vm798_vm2, %v559_v2 }
  0xe1   :  { %v561_v34 = vpop.permute.xlu0 %560 }
  0xe2   :  { %827 = vst.msk [vmem:[%s4732_s2 + $0xe0] sm:$0xff] %vm798_vm2, %v561_v34 }
  0xe3   :  { %v563_v50 = vpop.permute.xlu1 %562 }
  0xe4   :  { %828 = vst.msk [vmem:[%s4732_s2 + $0xe8] sm:$0xff] %vm798_vm2, %v563_v50 }
  0xe5   :  { %v565_v16 = vpop.permute.xlu0 %564 }
  0xe6   :  { %829 = vst.msk [vmem:[%s4732_s2 + $0xf0] sm:$0xff] %vm798_vm2, %v565_v16 }
  0xe7   :  { %v567_v35 = vpop.permute.xlu1 %566 }
  0xe8   :  { %830 = vst.msk [vmem:[%s4732_s2 + $0xf8] sm:$0xff] %vm798_vm2, %v567_v35 }
  0xe9   :  { %v569_v48 = vpop.permute.xlu0 %568 }
  0xea   :  { %831 = vst.msk [vmem:[%s4732_s2 + $0x100] sm:$0xff] %vm798_vm2, %v569_v48 }
  0xeb   :  { %v571_v40 = vpop.permute.xlu1 %570 }
  0xec   :  { %832 = vst.msk [vmem:[%s4732_s2 + $0x108] sm:$0xff] %vm798_vm2, %v571_v40 }
  0xed   :  { %v573_v49 = vpop.permute.xlu0 %572 }
  0xee   :  { %833 = vst.msk [vmem:[%s4732_s2 + $0x110] sm:$0xff] %vm798_vm2, %v573_v49 }
  0xef   :  { %v575_v41 = vpop.permute.xlu1 %574 }
  0xf0   :  { %834 = vst.msk [vmem:[%s4732_s2 + $0x118] sm:$0xff] %vm798_vm2, %v575_v41 }
  0xf1   :  { %v577_v47 = vpop.permute.xlu0 %576 }
  0xf2   :  { %835 = vst.msk [vmem:[%s4732_s2 + $0x120] sm:$0xff] %vm798_vm2, %v577_v47 }
  0xf3   :  { %v579_v42 = vpop.permute.xlu1 %578 }
  0xf4   :  { %836 = vst.msk [vmem:[%s4732_s2 + $0x128] sm:$0xff] %vm798_vm2, %v579_v42 }
  0xf5   :  { %v581_v62 = vpop.permute.xlu0 %580 }
  0xf6   :  { %837 = vst.msk [vmem:[%s4732_s2 + $0x130] sm:$0xff] %vm798_vm2, %v581_v62 }
  0xf7   :  { %v583_v54 = vpop.permute.xlu1 %582 }
  0xf8   :  { %838 = vst.msk [vmem:[%s4732_s2 + $0x138] sm:$0xff] %vm798_vm2, %v583_v54 }
  0xf9   :  { %v585_v3 = vpop.permute.xlu0 %584 }
  0xfa   :  { %839 = vst.msk [vmem:[%s4732_s2 + $0x140] sm:$0xff] %vm798_vm2, %v585_v3 }
  0xfb   :  { %v587_v55 = vpop.permute.xlu1 %586 }
  0xfc   :  { %840 = vst.msk [vmem:[%s4732_s2 + $0x148] sm:$0xff] %vm798_vm2, %v587_v55 }
  0xfd   :  { %v589_v53 = vpop.permute.xlu0 %588 }
  0xfe   :  { %841 = vst.msk [vmem:[%s4732_s2 + $0x150] sm:$0xff] %vm798_vm2, %v589_v53 }
  0xff   :  { %v591_v37 = vpop.permute.xlu1 %590 }
 0x100   :  { %842 = vst.msk [vmem:[%s4732_s2 + $0x158] sm:$0xff] %vm798_vm2, %v591_v37 }
 0x101   :  { %v593_v61 = vpop.permute.xlu0 %592 }
 0x102   :  { %843 = vst.msk [vmem:[%s4732_s2 + $0x160] sm:$0xff] %vm798_vm2, %v593_v61 }
 0x103   :  { %v595_v56 = vpop.permute.xlu1 %594 }
 0x104   :  { %844 = vst.msk [vmem:[%s4732_s2 + $0x168] sm:$0xff] %vm798_vm2, %v595_v56 }
 0x105   :  { %v597_v52 = vpop.permute.xlu0 %596 }
 0x106   :  { %845 = vst.msk [vmem:[%s4732_s2 + $0x170] sm:$0xff] %vm798_vm2, %v597_v52 }
 0x107   :  { %v599_v5 = vpop.permute.xlu1 %598 }
 0x108   :  { %846 = vst.msk [vmem:[%s4732_s2 + $0x178] sm:$0xff] %vm798_vm2, %v599_v5 }
 0x109   :  { %v601_v24 = vpop.permute.xlu0 %600 }
 0x10a   :  { %847 = vst.msk [vmem:[%s4732_s2 + $0x180] sm:$0xff] %vm798_vm2, %v601_v24 }
 0x10b   :  { %v603_v59 = vpop.permute.xlu1 %602 }
 0x10c   :  { %848 = vst.msk [vmem:[%s4732_s2 + $0x188] sm:$0xff] %vm798_vm2, %v603_v59 }
 0x10d   :  { %v605_v60 = vpop.permute.xlu0 %604 }
 0x10e   :  { %849 = vst.msk [vmem:[%s4732_s2 + $0x190] sm:$0xff] %vm798_vm2, %v605_v60 }
 0x10f   :  { %v607_v10 = vpop.permute.xlu1 %606 }
 0x110   :  { %850 = vst.msk [vmem:[%s4732_s2 + $0x198] sm:$0xff] %vm798_vm2, %v607_v10 }
 0x111   :  { %v609_v20 = vpop.permute.xlu0 %608 }
 0x112   :  { %851 = vst.msk [vmem:[%s4732_s2 + $0x1a0] sm:$0xff] %vm798_vm2, %v609_v20 }
 0x113   :  { %v611_v1 = vpop.permute.xlu1 %610 }
 0x114   :  { %852 = vst.msk [vmem:[%s4732_s2 + $0x1a8] sm:$0xff] %vm798_vm2, %v611_v1 }
 0x115   :  { %v613_v15 = vpop.permute.xlu0 %612 }
 0x116   :  { %853 = vst.msk [vmem:[%s4732_s2 + $0x1b0] sm:$0xff] %vm798_vm2, %v613_v15 }
 0x117   :  { %v615_v21 = vpop.permute.xlu1 %614 }
 0x118   :  { %854 = vst.msk [vmem:[%s4732_s2 + $0x1b8] sm:$0xff] %vm798_vm2, %v615_v21 }
 0x119   :  { %v617_v13 = vpop.permute.xlu0 %616 }
 0x11a   :  { %855 = vst.msk [vmem:[%s4732_s2 + $0x1c0] sm:$0xff] %vm798_vm2, %v617_v13 }
 0x11b   :  { %v619_v9 = vpop.permute.xlu1 %618 }
 0x11c   :  { %856 = vst.msk [vmem:[%s4732_s2 + $0x1c8] sm:$0xff] %vm798_vm2, %v619_v9 }
 0x11d   :  { %v621_v26 = vpop.permute.xlu0 %620 }
 0x11e   :  { %857 = vst.msk [vmem:[%s4732_s2 + $0x1d0] sm:$0xff] %vm798_vm2, %v621_v26 }
 0x11f   :  { %v623_v46 = vpop.permute.xlu1 %622 }
 0x120   :  { %858 = vst.msk [vmem:[%s4732_s2 + $0x1d8] sm:$0xff] %vm798_vm2, %v623_v46 }
 0x121   :  { %v625_v51 = vpop.permute.xlu0 %624 }
 0x122   :  { %859 = vst.msk [vmem:[%s4732_s2 + $0x1e0] sm:$0xff] %vm798_vm2, %v625_v51 }
 0x123   :  { %v627_v43 = vpop.permute.xlu1 %626 }
 0x124   :  { %860 = vst.msk [vmem:[%s4732_s2 + $0x1e8] sm:$0xff] %vm798_vm2, %v627_v43 }
 0x125   :  { %v629_v28 = vpop.permute.xlu0 %628 }
 0x126   :  { %861 = vst.msk [vmem:[%s4732_s2 + $0x1f0] sm:$0xff] %vm798_vm2, %v629_v28 }
 0x127   :  { %v631_v63 = vpop.permute.xlu1 %630 }
 0x128   :  { %862 = vst.msk [vmem:[%s4732_s2 + $0x1f8] sm:$0xff] %vm798_vm2, %v631_v63 }
 0x129   :  { %v633_v38 = vpop.permute.xlu0 %632 }
 0x12a   :  { %863 = vst.msk [vmem:[%s4732_s2 + $0x200] sm:$0xff] %vm798_vm2, %v633_v38 }
 0x12b   :  { %v635_v29 = vpop.permute.xlu1 %634 }
 0x12c   :  { %864 = vst.msk [vmem:[%s4732_s2 + $0x208] sm:$0xff] %vm798_vm2, %v635_v29 }
 0x12d   :  { %v637_v8 = vpop.permute.xlu0 %636 }
 0x12e   :  { %865 = vst.msk [vmem:[%s4732_s2 + $0x210] sm:$0xff] %vm798_vm2, %v637_v8 }
 0x12f   :  { %v639_v30 = vpop.permute.xlu1 %638 }
 0x130   :  { %866 = vst.msk [vmem:[%s4732_s2 + $0x218] sm:$0xff] %vm798_vm2, %v639_v30 }
 0x131   :  { %v641_v58 = vpop.permute.xlu0 %640 }
 0x132   :  { %867 = vst.msk [vmem:[%s4732_s2 + $0x220] sm:$0xff] %vm798_vm2, %v641_v58 }
 0x133   :  { %v643_v44 = vpop.permute.xlu1 %642 }
 0x134   :  { %868 = vst.msk [vmem:[%s4732_s2 + $0x228] sm:$0xff] %vm798_vm2, %v643_v44 }
 0x135   :  { %v645_v11 = vpop.permute.xlu0 %644 }
 0x136   :  { %869 = vst.msk [vmem:[%s4732_s2 + $0x230] sm:$0xff] %vm798_vm2, %v645_v11 }
 0x137   :  { %v647_v39 = vpop.permute.xlu1 %646 }
 0x138   :  { %870 = vst.msk [vmem:[%s4732_s2 + $0x238] sm:$0xff] %vm798_vm2, %v647_v39 }
 0x139   :  { %v649_v0 = vpop.permute.xlu0 %648 }
 0x13a   :  { %871 = vst.msk [vmem:[%s4732_s2 + $0x240] sm:$0xff] %vm798_vm2, %v649_v0 }
 0x13b   :  { %v651_v19 = vpop.permute.xlu1 %650 }
 0x13c   :  { %872 = vst.msk [vmem:[%s4732_s2 + $0x248] sm:$0xff] %vm798_vm2, %v651_v19 }
 0x13d   :  { %v653_v33 = vpop.permute.xlu0 %652 }
 0x13e   :  { %873 = vst.msk [vmem:[%s4732_s2 + $0x250] sm:$0xff] %vm798_vm2, %v653_v33 }
 0x13f   :  { %v655_v32 = vpop.permute.xlu1 %654 }
 0x140   :  { %874 = vst.msk [vmem:[%s4732_s2 + $0x258] sm:$0xff] %vm798_vm2, %v655_v32 }
 0x141   :  { %v657_v31 = vpop.permute.xlu0 %656 }
 0x142   :  { %875 = vst.msk [vmem:[%s4732_s2 + $0x260] sm:$0xff] %vm798_vm2, %v657_v31 }
 0x143   :  { %v659_v45 = vpop.permute.xlu1 %658 }
 0x144   :  { %876 = vst.msk [vmem:[%s4732_s2 + $0x268] sm:$0xff] %vm798_vm2, %v659_v45 }
 0x145   :  { %v661_v18 = vpop.permute.xlu0 %660 }
 0x146   :  { %877 = vst.msk [vmem:[%s4732_s2 + $0x270] sm:$0xff] %vm798_vm2, %v661_v18 }
 0x147   :  { %v663_v7 = vpop.permute.xlu1 %662 }
 0x148   :  { %878 = vst.msk [vmem:[%s4732_s2 + $0x278] sm:$0xff] %vm798_vm2, %v663_v7 }
 0x149   :  { %v665_v57 = vpop.permute.xlu0 %664 }
 0x14a   :  { %879 = vst.msk [vmem:[%s4732_s2 + $0x280] sm:$0xff] %vm798_vm2, %v665_v57 }
 0x14b   :  { %v667_v12 = vpop.permute.xlu1 %666 }
 0x14c   :  { %880 = vst.msk [vmem:[%s4732_s2 + $0x288] sm:$0xff] %vm798_vm2, %v667_v12 }
 0x14d   :  { %v669_v22 = vpop.permute.xlu0 %668 }
 0x14e   :  { %881 = vst.msk [vmem:[%s4732_s2 + $0x290] sm:$0xff] %vm798_vm2, %v669_v22 }
 0x14f   :  { %v671_v36 = vpop.permute.xlu1 %670 }
 0x150   :  { %882 = vst.msk [vmem:[%s4732_s2 + $0x298] sm:$0xff] %vm798_vm2, %v671_v36 }
 0x151   :  { %v673_v27 = vpop.permute.xlu0 %672 }
 0x152   :  { %883 = vst.msk [vmem:[%s4732_s2 + $0x2a0] sm:$0xff] %vm798_vm2, %v673_v27 }
 0x153   :  { %v675_v4 = vpop.permute.xlu1 %674 }
 0x154   :  { %884 = vst.msk [vmem:[%s4732_s2 + $0x2a8] sm:$0xff] %vm798_vm2, %v675_v4 }
 0x155   :  { %v677_v25 = vpop.permute.xlu0 %676 }
 0x156   :  { %885 = vst.msk [vmem:[%s4732_s2 + $0x2b0] sm:$0xff] %vm798_vm2, %v677_v25 }
 0x157   :  { %v679_v23 = vpop.permute.xlu1 %678 }
 0x158   :  { %886 = vst.msk [vmem:[%s4732_s2 + $0x2b8] sm:$0xff] %vm798_vm2, %v679_v23 }
 0x159   :  { %v681_v14 = vpop.permute.xlu0 %680 }
 0x15a   :  { %887 = vst.msk [vmem:[%s4732_s2 + $0x2c0] sm:$0xff] %vm798_vm2, %v681_v14 }
 0x15b   :  { %v683_v17 = vpop.permute.xlu1 %682 }
 0x15c   :  { %888 = vst.msk [vmem:[%s4732_s2 + $0x2c8] sm:$0xff] %vm798_vm2, %v683_v17 }
 0x15d   :  { %v685_v6 = vpop.permute.xlu0 %684 }
 0x15e   :  { %889 = vst.msk [vmem:[%s4732_s2 + $0x2d0] sm:$0xff] %vm798_vm2, %v685_v6 }
 0x15f   :  { %v687_v2 = vpop.permute.xlu1 %686 }
 0x160   :  { %890 = vst.msk [vmem:[%s4732_s2 + $0x2d8] sm:$0xff] %vm798_vm2, %v687_v2 }
 0x161   :  { %v689_v34 = vpop.permute.xlu0 %688 }
 0x162   :  { %891 = vst.msk [vmem:[%s4732_s2 + $0x2e0] sm:$0xff] %vm798_vm2, %v689_v34 }
 0x163   :  { %v691_v50 = vpop.permute.xlu1 %690 }
 0x164   :  { %892 = vst.msk [vmem:[%s4732_s2 + $0x2e8] sm:$0xff] %vm798_vm2, %v691_v50 }
 0x165   :  { %v693_v16 = vpop.permute.xlu0 %692 }
 0x166   :  { %893 = vst.msk [vmem:[%s4732_s2 + $0x2f0] sm:$0xff] %vm798_vm2, %v693_v16 }
 0x167   :  { %v695_v35 = vpop.permute.xlu1 %694 }
 0x168   :  { %894 = vst.msk [vmem:[%s4732_s2 + $0x2f8] sm:$0xff] %vm798_vm2, %v695_v35 }
 0x169   :  { %v697_v48 = vpop.permute.xlu0 %696 }
 0x16a   :  { %895 = vst.msk [vmem:[%s4732_s2 + $0x300] sm:$0xff] %vm798_vm2, %v697_v48 }
 0x16b   :  { %v699_v40 = vpop.permute.xlu1 %698 }
 0x16c   :  { %896 = vst.msk [vmem:[%s4732_s2 + $0x308] sm:$0xff] %vm798_vm2, %v699_v40 }

</bundles_post_ra>
